<compile_context>
chip_gen: v7x
topology: tpu7x:2x2x1
jax: 0.10.0
libtpu: 0.0.40
codegen_flags: <defaults>
</compile_context>

<pallas_src>
import functools

import numpy as np
import jax
import jax.numpy as jnp
from jax import lax
from jax.experimental import pallas as pl
from jax.experimental.pallas import tpu as pltpu

EPS = 1e-5          # InstanceNorm1d default eps
NEG_SLOPE = 0.1     # LeakyReLU slope


def _leaky(h):
    # Single vmax instead of cmp + select.
    return jnp.maximum(h, NEG_SLOPE * h)


def _instance_norm(h, axis):
    # InstanceNorm1d (affine=False): per-channel, per-sample stats over the
    # temporal axis, biased variance, eps=1e-5.  All in f32.
    mean = jnp.mean(h, axis=axis, keepdims=True)
    d = h - mean
    var = jnp.mean(d * d, axis=axis, keepdims=True)
    return d * lax.rsqrt(var + EPS)


def _conv_s2_block(h, t_in, w, b, pad_ref, *, mxu_dtype, fuse_taps, precision):
    """Conv1d(C, C, k=3, stride=2, padding=1) on a whole (bb, t_in, C) block.

    h:   (bb, t_in, C) f32 value
    w:   (3C, C) value (already in mxu_dtype) -- rows [kC:(k+1)C] = tap k
    b:   (1, C) f32
    pad_ref: (bb, T+2, C) f32 VMEM scratch; row 0 is kept zero by the caller.
    """
    bb, _, c = h.shape
    t_out = (t_in - 1) // 2 + 1
    # h_pad[:, 1:1+t_in] = h ; h_pad[:, 0] stays zero (zeroed once per step).
    pad_ref[:, 1:1 + t_in, :] = h
    if 2 * t_out > t_in:
        # Odd t_in: the right zero-pad row is actually read -> rewrite it
        # (it may hold stale rows from the previous, longer layer).
        pad_ref[:, t_in + 1:t_in + 2, :] = jnp.zeros((bb, 1, c), jnp.float32)

    # tap k of output row i is h_pad[2*i + k]; read every row of a tap for the
    # whole batch block with a single stride-2 sublane slice.
    taps = [pad_ref[:, pl.ds(k, t_out, stride=2), :] for k in range(3)]
    m = bb * t_out

    if fuse_taps:
        # H lane-aligned: one fused K=3C matmul for the whole block.
        g = jnp.concatenate(taps, axis=2).reshape(m, 3 * c).astype(mxu_dtype)
        y = jnp.dot(g, w, preferred_element_type=jnp.float32,
                    precision=precision)
    else:
        # H not a multiple of 128: avoid unaligned cross-lane concat; three
        # accumulating (M, C) @ (C, C) matmuls with f32 accumulation.
        y = jnp.zeros((m, c), jnp.float32)
        for k in range(3):
            tk = taps[k].reshape(m, c).astype(mxu_dtype)
            y = y + jnp.dot(tk, w[k * c:(k + 1) * c, :],
                            preferred_element_type=jnp.float32,
                            precision=precision)
    return y.reshape(bb, t_out, c) + b.reshape(1, 1, c)


def _prosodic_kernel(x_ref, w1_ref, w2_ref, b2_ref, w3_ref, b3_ref, o_ref,
                     pad_ref, *, seq_len, batch_block, hidden, mxu_dtype,
                     fuse_taps, precision):
    t1 = seq_len
    t2 = (t1 - 1) // 2 + 1
    t3 = (t2 - 1) // 2 + 1
    bb = batch_block
    hd = hidden

    # Left zero-pad row: zeroed once per grid step, never overwritten after.
    pad_ref[:, 0:1, :] = jnp.zeros((bb, 1, hd), jnp.float32)

    x = x_ref[...]            # (bb, T, 2) f32
    w1 = w1_ref[...]          # (2, H)  f32
    w2 = w2_ref[...]          # (3H, H) mxu_dtype (pre-cast in wrapper)
    b2 = b2_ref[...]          # (1, H)  f32
    w3 = w3_ref[...]          # (3H, H) mxu_dtype
    b3 = b3_ref[...]          # (1, H)  f32

    # Conv1d(2, H, k=1, bias=False): a K=2 matmul wastes the MXU -- two VPU
    # broadcast FMAs over the whole (bb, T, H) block instead.
    h = (x[:, :, 0:1] * w1[0:1, :].reshape(1, 1, hd)
         + x[:, :, 1:2] * w1[1:2, :].reshape(1, 1, hd))        # (bb, T, H) f32
    h = _instance_norm(_leaky(h), axis=1)

    # Conv1d(H, H, k=3, s=2, p=1) + LeakyReLU + InstanceNorm, twice.
    h = _instance_norm(
        _leaky(_conv_s2_block(h, t1, w2, b2, pad_ref, mxu_dtype=mxu_dtype,
                              fuse_taps=fuse_taps, precision=precision)),
        axis=1)                                                # (bb, T2, H)
    h = _instance_norm(
        _leaky(_conv_s2_block(h, t2, w3, b3, pad_ref, mxu_dtype=mxu_dtype,
                              fuse_taps=fuse_taps, precision=precision)),
        axis=1)                                                # (bb, T3, H)

    # Store all bb rows as one contiguous (bb*T3, H) slab (single store
    # region per grid step; minor dim preserved -> layout-cheap reshape).
    o_ref[...] = h.reshape(bb * t3, hd).astype(o_ref.dtype)


def continuous_prosodic_net(x, w1, w2, b2, w3, b3, *,
                            matmul_dtype=jnp.float32, batch_block=None):
    """x: (B, T, 2) f32 -> (B, T_out, H) f32.

    Parameters (pre-transposed for channels-last matmuls):
      w1: (2, H)        Conv1d(2, H, 1) weight,  w1[cin, cout]
      w2, w3: (3, H, H) Conv1d(H, H, 3) weights, w[k, cin, cout]
      b2, b3: (1, H)    biases
    matmul_dtype: jnp.float32 (near-exact; precision=HIGHEST) or jnp.bfloat16
      (faster MXU; accumulation and all norms stay f32).
    batch_block: rows per grid step.  Default B (grid=1) -- optimal on
      single-TensorCore v5e/v6e.  On v7x pass B//2 so the "parallel" batch
      axis shards across both TensorCores.
    """
    B, T, cin = x.shape
    assert cin == 2
    H = w1.shape[1]
    T2 = (T - 1) // 2 + 1
    T3 = (T2 - 1) // 2 + 1

    bb = B if batch_block is None else batch_block
    assert B % bb == 0, (B, bb)
    # Output block is (bb*T3, H); keep its sublane extent legal.
    assert bb == B or (bb * T3) % 8 == 0, (
        "batch_block must be B or make bb*T3 a multiple of 8", bb, T3)

    fuse_taps = (H % 128 == 0)   # fused K=3H matmul only when lane-aligned
    precision = (lax.Precision.HIGHEST if matmul_dtype == jnp.float32
                 else None)

    # Fuse the three k=3 taps into one (3H, H) weight; pre-cast to the MXU
    # dtype in the wrapper (halves weight DMA bytes on the bf16 path, removes
    # the per-step in-kernel cast).
    w2f = w2.reshape(3 * H, H).astype(matmul_dtype)
    w3f = w3.reshape(3 * H, H).astype(matmul_dtype)

    kernel = functools.partial(
        _prosodic_kernel, seq_len=T, batch_block=bb, hidden=H,
        mxu_dtype=matmul_dtype, fuse_taps=fuse_taps, precision=precision)

    out = pl.pallas_call(
        kernel,
        out_shape=jax.ShapeDtypeStruct((B * T3, H), jnp.float32),
        grid=(B // bb,),
        in_specs=[
            pl.BlockSpec((bb, T, 2), lambda i: (i, 0, 0)),
            pl.BlockSpec((2, H), lambda i: (0, 0)),
            pl.BlockSpec((3 * H, H), lambda i: (0, 0)),
            pl.BlockSpec((1, H), lambda i: (0, 0)),
            pl.BlockSpec((3 * H, H), lambda i: (0, 0)),
            pl.BlockSpec((1, H), lambda i: (0, 0)),
        ],
        out_specs=pl.BlockSpec((bb * T3, H), lambda i: (i, 0)),
        scratch_shapes=[pltpu.VMEM((bb, T + 2, H), jnp.float32)],
        compiler_params=pltpu.CompilerParams(
            dimension_semantics=("parallel",)),
    )(x, w1, w2f, b2, w3f, b3)
    return out.reshape(B, T3, H)


def _reference(x, w1, w2, b2, w3, b3, matmul_dtype=jnp.float32,
               precision=None):
    # Pure-JAX reference with the same channels-last convention.
    H = w1.shape[1]
    w2f = w2.reshape(3 * H, H).astype(matmul_dtype)
    w3f = w3.reshape(3 * H, H).astype(matmul_dtype)

    def conv_s2(h, wf, bias):
        t_in = h.shape[0]
        t_out = (t_in - 1) // 2 + 1
        hp = jnp.pad(h, ((1, 1), (0, 0)))
        g = jnp.concatenate([hp[k::2][:t_out] for k in range(3)], axis=1)
        return jnp.dot(g.astype(matmul_dtype), wf,
                       preferred_element_type=jnp.float32,
                       precision=precision) + bias

    def per_batch(xb):
        h = xb[:, 0:1] * w1[0:1, :] + xb[:, 1:2] * w1[1:2, :]   # k=1 conv, f32
        h = _instance_norm(_leaky(h), axis=0)
        h = _instance_norm(_leaky(conv_s2(h, w2f, b2)), axis=0)
        h = _instance_norm(_leaky(conv_s2(h, w3f, b3)), axis=0)
        return h

    return jax.vmap(per_batch)(x)


if __name__ == "__main__":
    B, T, H = 4, 16, 32   # batch=4, seq=16, hidden_dim=32

    key = jax.random.PRNGKey(0)
    ks = jax.random.split(key, 6)
    x = jax.random.normal(ks[0], (B, T, 2), jnp.float32)
    # Deterministic synthetic parameters (shapes follow the torch convs,
    # stored pre-transposed for channels-last matmuls):
    #   Conv1d(2,H,1) weight (H,2,1) -> w1 (2,H)
    #   Conv1d(H,H,3) weight (H,H,3) -> w  (3,H,H)   (w[k,cin,cout])
    w1 = jax.random.normal(ks[1], (2, H), jnp.float32) * 0.5
    w2 = jax.random.normal(ks[2], (3, H, H), jnp.float32) * (1.0 / np.sqrt(3 * H))
    b2 = jax.random.normal(ks[3], (1, H), jnp.float32) * 0.1
    w3 = jax.random.normal(ks[4], (3, H, H), jnp.float32) * (1.0 / np.sqrt(3 * H))
    b3 = jax.random.normal(ks[5], (1, H), jnp.float32) * 0.1

    T2 = (T - 1) // 2 + 1
    T3 = (T2 - 1) // 2 + 1

    # f32 MXU path (precision=HIGHEST): matches the torch module closely.
    out = continuous_prosodic_net(x, w1, w2, b2, w3, b3)
    out = jax.block_until_ready(out)
    assert out.shape == (B, T3, H), out.shape
    ref = _reference(x, w1, w2, b2, w3, b3,
                     precision=lax.Precision.HIGHEST)
    np.testing.assert_allclose(np.asarray(out), np.asarray(ref),
                               rtol=1e-4, atol=1e-4)

    # bf16 MXU path (recommended on v6e/v7x): f32 accumulation, f32 norms.
    out_bf16 = continuous_prosodic_net(x, w1, w2, b2, w3, b3,
                                       matmul_dtype=jnp.bfloat16)
    out_bf16 = jax.block_until_ready(out_bf16)
    ref_bf16 = _reference(x, w1, w2, b2, w3, b3, matmul_dtype=jnp.bfloat16)
    np.testing.assert_allclose(np.asarray(out_bf16), np.asarray(ref_bf16),
                               rtol=3e-2, atol=3e-2)

    print("KERNEL_OK")
</pallas_src>

<mosaic_0001>
module attributes {stable_mosaic.version = 11 : i64} {
  func.func @_prosodic_kernel(%arg0: i32, %arg1: memref<4x16x2xf32, #tpu.memory_space<vmem>>, %arg2: memref<2x32xf32, #tpu.memory_space<vmem>>, %arg3: memref<96x32xf32, #tpu.memory_space<vmem>>, %arg4: memref<1x32xf32, #tpu.memory_space<vmem>>, %arg5: memref<96x32xf32, #tpu.memory_space<vmem>>, %arg6: memref<1x32xf32, #tpu.memory_space<vmem>>, %arg7: memref<16x32xf32, #tpu.memory_space<vmem>>, %arg8: memref<4x18x32xf32, #tpu.memory_space<vmem>>) attributes {dimension_semantics = [#tpu.dimension_semantics<parallel>], iteration_bounds = array<i64: 1>, scalar_prefetch = 0 : i64, scratch_operands = 1 : i64, tpu.core_type = #tpu.core_type<tc>, window_params = [{transform_indices = @transform_0, window_bounds = array<i64: 4, 16, 2>}, {pipeline_mode = #tpu.pipeline_mode<synchronous>, transform_indices = @transform_1, window_bounds = array<i64: 2, 32>}, {pipeline_mode = #tpu.pipeline_mode<synchronous>, transform_indices = @transform_2, window_bounds = array<i64: 96, 32>}, {pipeline_mode = #tpu.pipeline_mode<synchronous>, transform_indices = @transform_3, window_bounds = array<i64: 1, 32>}, {pipeline_mode = #tpu.pipeline_mode<synchronous>, transform_indices = @transform_4, window_bounds = array<i64: 96, 32>}, {pipeline_mode = #tpu.pipeline_mode<synchronous>, transform_indices = @transform_5, window_bounds = array<i64: 1, 32>}, {transform_indices = @transform_6, window_bounds = array<i64: 16, 32>}]} {
    %cst = arith.constant 0.000000e+00 : f32
    %0 = vector.broadcast %cst : f32 to vector<4x1x32xf32>
    %c0 = arith.constant 0 : index
    %c0_0 = arith.constant 0 : index
    %c0_1 = arith.constant 0 : index
    %1 = vector.load %arg8[%c0, %c0_0, %c0_1] : memref<4x18x32xf32, #tpu.memory_space<vmem>>, vector<4x1x32xf32>
    tpu.vector_store %arg8[%c0, %c0_0, %c0_1], %0 {strides = array<i32>} : memref<4x18x32xf32, #tpu.memory_space<vmem>>, vector<4x1x32xf32>,
    %c0_2 = arith.constant 0 : index
    %c0_3 = arith.constant 0 : index
    %c0_4 = arith.constant 0 : index
    %2 = vector.load %arg1[%c0_2, %c0_3, %c0_4] : memref<4x16x2xf32, #tpu.memory_space<vmem>>, vector<4x16x2xf32>
    %c0_5 = arith.constant 0 : index
    %c0_6 = arith.constant 0 : index
    %3 = vector.load %arg2[%c0_5, %c0_6] : memref<2x32xf32, #tpu.memory_space<vmem>>, vector<2x32xf32>
    %c0_7 = arith.constant 0 : index
    %c0_8 = arith.constant 0 : index
    %4 = vector.load %arg3[%c0_7, %c0_8] : memref<96x32xf32, #tpu.memory_space<vmem>>, vector<96x32xf32>
    %c0_9 = arith.constant 0 : index
    %c0_10 = arith.constant 0 : index
    %5 = vector.load %arg4[%c0_9, %c0_10] : memref<1x32xf32, #tpu.memory_space<vmem>>, vector<1x32xf32>
    %c0_11 = arith.constant 0 : index
    %c0_12 = arith.constant 0 : index
    %6 = vector.load %arg5[%c0_11, %c0_12] : memref<96x32xf32, #tpu.memory_space<vmem>>, vector<96x32xf32>
    %c0_13 = arith.constant 0 : index
    %c0_14 = arith.constant 0 : index
    %7 = vector.load %arg6[%c0_13, %c0_14] : memref<1x32xf32, #tpu.memory_space<vmem>>, vector<1x32xf32>
    %8 = vector.extract_strided_slice %2 {offsets = [0, 0, 0], sizes = [4, 16, 1], strides = [1, 1, 1]} : vector<4x16x2xf32> to vector<4x16x1xf32>
    %9 = vector.extract_strided_slice %3 {offsets = [0, 0], sizes = [1, 32], strides = [1, 1]} : vector<2x32xf32> to vector<1x32xf32>
    %10 = vector.shape_cast %9 : vector<1x32xf32> to vector<1x1x32xf32>
    %11 = vector.broadcast %8 : vector<4x16x1xf32> to vector<4x16x32xf32>
    %12 = vector.broadcast %10 : vector<1x1x32xf32> to vector<4x16x32xf32>
    %13 = arith.mulf %11, %12 : vector<4x16x32xf32>
    %14 = vector.extract_strided_slice %2 {offsets = [0, 0, 1], sizes = [4, 16, 1], strides = [1, 1, 1]} : vector<4x16x2xf32> to vector<4x16x1xf32>
    %15 = vector.extract_strided_slice %3 {offsets = [1, 0], sizes = [1, 32], strides = [1, 1]} : vector<2x32xf32> to vector<1x32xf32>
    %16 = vector.shape_cast %15 : vector<1x32xf32> to vector<1x1x32xf32>
    %17 = vector.broadcast %14 : vector<4x16x1xf32> to vector<4x16x32xf32>
    %18 = vector.broadcast %16 : vector<1x1x32xf32> to vector<4x16x32xf32>
    %19 = arith.mulf %17, %18 : vector<4x16x32xf32>
    %20 = arith.addf %13, %19 : vector<4x16x32xf32>
    %cst_15 = arith.constant 1.000000e-01 : f32
    %21 = vector.broadcast %cst_15 : f32 to vector<4x16x32xf32>
    %22 = arith.mulf %21, %20 : vector<4x16x32xf32>
    %23 = arith.maximumf %20, %22 : vector<4x16x32xf32>
    %cst_16 = arith.constant dense<0.000000e+00> : vector<4x32xf32>
    %24 = vector.multi_reduction <add>, %23, %cst_16 [1] : vector<4x16x32xf32> to vector<4x32xf32>
    %25 = vector.shape_cast %24 : vector<4x32xf32> to vector<4x1x32xf32>
    %cst_17 = arith.constant 1.600000e+01 : f32
    %26 = vector.broadcast %cst_17 : f32 to vector<4x1x32xf32>
    %27 = arith.divf %25, %26 : vector<4x1x32xf32>
    %28 = vector.broadcast %27 : vector<4x1x32xf32> to vector<4x16x32xf32>
    %29 = arith.subf %23, %28 : vector<4x16x32xf32>
    %30 = arith.mulf %29, %29 : vector<4x16x32xf32>
    %cst_18 = arith.constant dense<0.000000e+00> : vector<4x32xf32>
    %31 = vector.multi_reduction <add>, %30, %cst_18 [1] : vector<4x16x32xf32> to vector<4x32xf32>
    %32 = vector.shape_cast %31 : vector<4x32xf32> to vector<4x1x32xf32>
    %cst_19 = arith.constant 1.600000e+01 : f32
    %33 = vector.broadcast %cst_19 : f32 to vector<4x1x32xf32>
    %34 = arith.divf %32, %33 : vector<4x1x32xf32>
    %cst_20 = arith.constant 9.99999974E-6 : f32
    %35 = vector.broadcast %cst_20 : f32 to vector<4x1x32xf32>
    %36 = arith.addf %34, %35 : vector<4x1x32xf32>
    %37 = math.rsqrt %36 : vector<4x1x32xf32>
    %38 = vector.broadcast %37 : vector<4x1x32xf32> to vector<4x16x32xf32>
    %39 = arith.mulf %29, %38 : vector<4x16x32xf32>
    %c0_21 = arith.constant 0 : index
    %c1 = arith.constant 1 : index
    %c0_22 = arith.constant 0 : index
    %40 = vector.load %arg8[%c0_21, %c1, %c0_22] : memref<4x18x32xf32, #tpu.memory_space<vmem>>, vector<4x16x32xf32>
    tpu.vector_store %arg8[%c0_21, %c1, %c0_22], %39 {strides = array<i32>} : memref<4x18x32xf32, #tpu.memory_space<vmem>>, vector<4x16x32xf32>,
    %c0_23 = arith.constant 0 : index
    %c0_24 = arith.constant 0 : index
    %c0_25 = arith.constant 0 : index
    %41 = tpu.strided_load %arg8[%c0_23, %c0_24, %c0_25] {strides = array<i32: 1, 2, 1>} : memref<4x18x32xf32, #tpu.memory_space<vmem>>, vector<4x8x32xf32>
    %c0_26 = arith.constant 0 : index
    %c1_27 = arith.constant 1 : index
    %c0_28 = arith.constant 0 : index
    %42 = tpu.strided_load %arg8[%c0_26, %c1_27, %c0_28] {strides = array<i32: 1, 2, 1>} : memref<4x18x32xf32, #tpu.memory_space<vmem>>, vector<4x8x32xf32>
    %c0_29 = arith.constant 0 : index
    %c2 = arith.constant 2 : index
    %c0_30 = arith.constant 0 : index
    %43 = tpu.strided_load %arg8[%c0_29, %c2, %c0_30] {strides = array<i32: 1, 2, 1>} : memref<4x18x32xf32, #tpu.memory_space<vmem>>, vector<4x8x32xf32>
    %cst_31 = arith.constant 0.000000e+00 : f32
    %44 = vector.broadcast %cst_31 : f32 to vector<32x32xf32>
    %45 = vector.shape_cast %41 : vector<4x8x32xf32> to vector<32x32xf32>
    %46 = vector.extract_strided_slice %4 {offsets = [0, 0], sizes = [32, 32], strides = [1, 1]} : vector<96x32xf32> to vector<32x32xf32>
    %cst_32 = arith.constant dense<0.000000e+00> : vector<32x32xf32>
    %47 = tpu.matmul %45, %46, %cst_32 {dimension_numbers = #tpu.dot_dimension_numbers<[1], [0], [0], [1], [0, 0, 1, 1], [], []>, precision = #tpu.contract_precision<fp32>} : vector<32x32xf32>, vector<32x32xf32>, vector<32x32xf32> -> vector<32x32xf32>
    %48 = arith.addf %44, %47 : vector<32x32xf32>
    %49 = vector.shape_cast %42 : vector<4x8x32xf32> to vector<32x32xf32>
    %50 = vector.extract_strided_slice %4 {offsets = [32, 0], sizes = [32, 32], strides = [1, 1]} : vector<96x32xf32> to vector<32x32xf32>
    %cst_33 = arith.constant dense<0.000000e+00> : vector<32x32xf32>
    %51 = tpu.matmul %49, %50, %cst_33 {dimension_numbers = #tpu.dot_dimension_numbers<[1], [0], [0], [1], [0, 0, 1, 1], [], []>, precision = #tpu.contract_precision<fp32>} : vector<32x32xf32>, vector<32x32xf32>, vector<32x32xf32> -> vector<32x32xf32>
    %52 = arith.addf %48, %51 : vector<32x32xf32>
    %53 = vector.shape_cast %43 : vector<4x8x32xf32> to vector<32x32xf32>
    %54 = vector.extract_strided_slice %4 {offsets = [64, 0], sizes = [32, 32], strides = [1, 1]} : vector<96x32xf32> to vector<32x32xf32>
    %cst_34 = arith.constant dense<0.000000e+00> : vector<32x32xf32>
    %55 = tpu.matmul %53, %54, %cst_34 {dimension_numbers = #tpu.dot_dimension_numbers<[1], [0], [0], [1], [0, 0, 1, 1], [], []>, precision = #tpu.contract_precision<fp32>} : vector<32x32xf32>, vector<32x32xf32>, vector<32x32xf32> -> vector<32x32xf32>
    %56 = arith.addf %52, %55 : vector<32x32xf32>
    %57 = vector.shape_cast %56 : vector<32x32xf32> to vector<4x8x32xf32>
    %58 = vector.shape_cast %5 : vector<1x32xf32> to vector<1x1x32xf32>
    %59 = vector.broadcast %58 : vector<1x1x32xf32> to vector<4x8x32xf32>
    %60 = arith.addf %57, %59 : vector<4x8x32xf32>
    %cst_35 = arith.constant 1.000000e-01 : f32
    %61 = vector.broadcast %cst_35 : f32 to vector<4x8x32xf32>
    %62 = arith.mulf %61, %60 : vector<4x8x32xf32>
    %63 = arith.maximumf %60, %62 : vector<4x8x32xf32>
    %cst_36 = arith.constant dense<0.000000e+00> : vector<4x32xf32>
    %64 = vector.multi_reduction <add>, %63, %cst_36 [1] : vector<4x8x32xf32> to vector<4x32xf32>
    %65 = vector.shape_cast %64 : vector<4x32xf32> to vector<4x1x32xf32>
    %cst_37 = arith.constant 8.000000e+00 : f32
    %66 = vector.broadcast %cst_37 : f32 to vector<4x1x32xf32>
    %67 = arith.divf %65, %66 : vector<4x1x32xf32>
    %68 = vector.broadcast %67 : vector<4x1x32xf32> to vector<4x8x32xf32>
    %69 = arith.subf %63, %68 : vector<4x8x32xf32>
    %70 = arith.mulf %69, %69 : vector<4x8x32xf32>
    %cst_38 = arith.constant dense<0.000000e+00> : vector<4x32xf32>
    %71 = vector.multi_reduction <add>, %70, %cst_38 [1] : vector<4x8x32xf32> to vector<4x32xf32>
    %72 = vector.shape_cast %71 : vector<4x32xf32> to vector<4x1x32xf32>
    %cst_39 = arith.constant 8.000000e+00 : f32
    %73 = vector.broadcast %cst_39 : f32 to vector<4x1x32xf32>
    %74 = arith.divf %72, %73 : vector<4x1x32xf32>
    %cst_40 = arith.constant 9.99999974E-6 : f32
    %75 = vector.broadcast %cst_40 : f32 to vector<4x1x32xf32>
    %76 = arith.addf %74, %75 : vector<4x1x32xf32>
    %77 = math.rsqrt %76 : vector<4x1x32xf32>
    %78 = vector.broadcast %77 : vector<4x1x32xf32> to vector<4x8x32xf32>
    %79 = arith.mulf %69, %78 : vector<4x8x32xf32>
    %c0_41 = arith.constant 0 : index
    %c1_42 = arith.constant 1 : index
    %c0_43 = arith.constant 0 : index
    %80 = vector.load %arg8[%c0_41, %c1_42, %c0_43] : memref<4x18x32xf32, #tpu.memory_space<vmem>>, vector<4x8x32xf32>
    tpu.vector_store %arg8[%c0_41, %c1_42, %c0_43], %79 {strides = array<i32>} : memref<4x18x32xf32, #tpu.memory_space<vmem>>, vector<4x8x32xf32>,
    %c0_44 = arith.constant 0 : index
    %c0_45 = arith.constant 0 : index
    %c0_46 = arith.constant 0 : index
    %81 = tpu.strided_load %arg8[%c0_44, %c0_45, %c0_46] {strides = array<i32: 1, 2, 1>} : memref<4x18x32xf32, #tpu.memory_space<vmem>>, vector<4x4x32xf32>
    %c0_47 = arith.constant 0 : index
    %c1_48 = arith.constant 1 : index
    %c0_49 = arith.constant 0 : index
    %82 = tpu.strided_load %arg8[%c0_47, %c1_48, %c0_49] {strides = array<i32: 1, 2, 1>} : memref<4x18x32xf32, #tpu.memory_space<vmem>>, vector<4x4x32xf32>
    %c0_50 = arith.constant 0 : index
    %c2_51 = arith.constant 2 : index
    %c0_52 = arith.constant 0 : index
    %83 = tpu.strided_load %arg8[%c0_50, %c2_51, %c0_52] {strides = array<i32: 1, 2, 1>} : memref<4x18x32xf32, #tpu.memory_space<vmem>>, vector<4x4x32xf32>
    %cst_53 = arith.constant 0.000000e+00 : f32
    %84 = vector.broadcast %cst_53 : f32 to vector<16x32xf32>
    %85 = vector.shape_cast %81 : vector<4x4x32xf32> to vector<16x32xf32>
    %86 = vector.extract_strided_slice %6 {offsets = [0, 0], sizes = [32, 32], strides = [1, 1]} : vector<96x32xf32> to vector<32x32xf32>
    %cst_54 = arith.constant dense<0.000000e+00> : vector<16x32xf32>
    %87 = tpu.matmul %85, %86, %cst_54 {dimension_numbers = #tpu.dot_dimension_numbers<[1], [0], [0], [1], [0, 0, 1, 1], [], []>, precision = #tpu.contract_precision<fp32>} : vector<16x32xf32>, vector<32x32xf32>, vector<16x32xf32> -> vector<16x32xf32>
    %88 = arith.addf %84, %87 : vector<16x32xf32>
    %89 = vector.shape_cast %82 : vector<4x4x32xf32> to vector<16x32xf32>
    %90 = vector.extract_strided_slice %6 {offsets = [32, 0], sizes = [32, 32], strides = [1, 1]} : vector<96x32xf32> to vector<32x32xf32>
    %cst_55 = arith.constant dense<0.000000e+00> : vector<16x32xf32>
    %91 = tpu.matmul %89, %90, %cst_55 {dimension_numbers = #tpu.dot_dimension_numbers<[1], [0], [0], [1], [0, 0, 1, 1], [], []>, precision = #tpu.contract_precision<fp32>} : vector<16x32xf32>, vector<32x32xf32>, vector<16x32xf32> -> vector<16x32xf32>
    %92 = arith.addf %88, %91 : vector<16x32xf32>
    %93 = vector.shape_cast %83 : vector<4x4x32xf32> to vector<16x32xf32>
    %94 = vector.extract_strided_slice %6 {offsets = [64, 0], sizes = [32, 32], strides = [1, 1]} : vector<96x32xf32> to vector<32x32xf32>
    %cst_56 = arith.constant dense<0.000000e+00> : vector<16x32xf32>
    %95 = tpu.matmul %93, %94, %cst_56 {dimension_numbers = #tpu.dot_dimension_numbers<[1], [0], [0], [1], [0, 0, 1, 1], [], []>, precision = #tpu.contract_precision<fp32>} : vector<16x32xf32>, vector<32x32xf32>, vector<16x32xf32> -> vector<16x32xf32>
    %96 = arith.addf %92, %95 : vector<16x32xf32>
    %97 = vector.shape_cast %96 : vector<16x32xf32> to vector<4x4x32xf32>
    %98 = vector.shape_cast %7 : vector<1x32xf32> to vector<1x1x32xf32>
    %99 = vector.broadcast %98 : vector<1x1x32xf32> to vector<4x4x32xf32>
    %100 = arith.addf %97, %99 : vector<4x4x32xf32>
    %cst_57 = arith.constant 1.000000e-01 : f32
    %101 = vector.broadcast %cst_57 : f32 to vector<4x4x32xf32>
    %102 = arith.mulf %101, %100 : vector<4x4x32xf32>
    %103 = arith.maximumf %100, %102 : vector<4x4x32xf32>
    %cst_58 = arith.constant dense<0.000000e+00> : vector<4x32xf32>
    %104 = vector.multi_reduction <add>, %103, %cst_58 [1] : vector<4x4x32xf32> to vector<4x32xf32>
    %105 = vector.shape_cast %104 : vector<4x32xf32> to vector<4x1x32xf32>
    %cst_59 = arith.constant 4.000000e+00 : f32
    %106 = vector.broadcast %cst_59 : f32 to vector<4x1x32xf32>
    %107 = arith.divf %105, %106 : vector<4x1x32xf32>
    %108 = vector.broadcast %107 : vector<4x1x32xf32> to vector<4x4x32xf32>
    %109 = arith.subf %103, %108 : vector<4x4x32xf32>
    %110 = arith.mulf %109, %109 : vector<4x4x32xf32>
    %cst_60 = arith.constant dense<0.000000e+00> : vector<4x32xf32>
    %111 = vector.multi_reduction <add>, %110, %cst_60 [1] : vector<4x4x32xf32> to vector<4x32xf32>
    %112 = vector.shape_cast %111 : vector<4x32xf32> to vector<4x1x32xf32>
    %cst_61 = arith.constant 4.000000e+00 : f32
    %113 = vector.broadcast %cst_61 : f32 to vector<4x1x32xf32>
    %114 = arith.divf %112, %113 : vector<4x1x32xf32>
    %cst_62 = arith.constant 9.99999974E-6 : f32
    %115 = vector.broadcast %cst_62 : f32 to vector<4x1x32xf32>
    %116 = arith.addf %114, %115 : vector<4x1x32xf32>
    %117 = math.rsqrt %116 : vector<4x1x32xf32>
    %118 = vector.broadcast %117 : vector<4x1x32xf32> to vector<4x4x32xf32>
    %119 = arith.mulf %109, %118 : vector<4x4x32xf32>
    %120 = vector.shape_cast %119 : vector<4x4x32xf32> to vector<16x32xf32>
    %c0_63 = arith.constant 0 : index
    %c0_64 = arith.constant 0 : index
    %121 = vector.load %arg7[%c0_63, %c0_64] : memref<16x32xf32, #tpu.memory_space<vmem>>, vector<16x32xf32>
    tpu.vector_store %arg7[%c0_63, %c0_64], %120 {strides = array<i32>} : memref<16x32xf32, #tpu.memory_space<vmem>>, vector<16x32xf32>,
    return
  }
  func.func @transform_0(%arg0: i32) -> (i32, i32, i32) {
    %c0_i32 = arith.constant 0 : i32
    %c0_i32_0 = arith.constant 0 : i32
    %c0_i32_1 = arith.constant 0 : i32
    return %arg0, %c0_i32, %c0_i32_0 : i32, i32, i32
  }
  func.func @transform_1(%arg0: i32) -> (i32, i32) {
    %c0_i32 = arith.constant 0 : i32
    %c0_i32_0 = arith.constant 0 : i32
    %c0_i32_1 = arith.constant 0 : i32
    return %c0_i32, %c0_i32_0 : i32, i32
  }
  func.func @transform_2(%arg0: i32) -> (i32, i32) {
    %c0_i32 = arith.constant 0 : i32
    %c0_i32_0 = arith.constant 0 : i32
    %c0_i32_1 = arith.constant 0 : i32
    return %c0_i32, %c0_i32_0 : i32, i32
  }
  func.func @transform_3(%arg0: i32) -> (i32, i32) {
    %c0_i32 = arith.constant 0 : i32
    %c0_i32_0 = arith.constant 0 : i32
    %c0_i32_1 = arith.constant 0 : i32
    return %c0_i32, %c0_i32_0 : i32, i32
  }
  func.func @transform_4(%arg0: i32) -> (i32, i32) {
    %c0_i32 = arith.constant 0 : i32
    %c0_i32_0 = arith.constant 0 : i32
    %c0_i32_1 = arith.constant 0 : i32
    return %c0_i32, %c0_i32_0 : i32, i32
  }
  func.func @transform_5(%arg0: i32) -> (i32, i32) {
    %c0_i32 = arith.constant 0 : i32
    %c0_i32_0 = arith.constant 0 : i32
    %c0_i32_1 = arith.constant 0 : i32
    return %c0_i32, %c0_i32_0 : i32, i32
  }
  func.func @transform_6(%arg0: i32) -> (i32, i32) {
    %c0_i32 = arith.constant 0 : i32
    %c0_i32_0 = arith.constant 0 : i32
    return %arg0, %c0_i32 : i32, i32
  }
}

</mosaic_0001>

<bundles_post_ra>
// kernel: tpu_custom_call.1
= control target key start
LH: loop header
LB: loop body
LE: loop exit
PB: predicated region body
PF: predicated region fallthrough
CT: control target
= control target key end

     0   :  { %v5239_v1 = vmov 1   ;;  %v5240_v2 = vmov 0   ;;  %s5888_s0 = inlined_call_operand.vmem [shape: f32[4,16,2], index: 0, kind: input, shape index: {}]   ;;  %s5889_s1 = inlined_call_operand.vmem [shape: f32[2,32], index: 1, kind: input, shape index: {}]   ;;  %s5890_s2 = inlined_call_operand.vmem [shape: f32[96,32], index: 2, kind: input, shape index: {}]   ;;  %s5891_s3 = inlined_call_operand.vmem [shape: f32[1,32], index: 3, kind: input, shape index: {}]   ;;  %s5892_s4 = inlined_call_operand.vmem [shape: f32[96,32], index: 4, kind: input, shape index: {}]   ;;  %s5893_s5 = inlined_call_operand.vmem [shape: f32[1,32], index: 5, kind: input, shape index: {}]   ;;  %s5894_s6 = inlined_call_operand.hbm [shape: f32[16,32], index: 6, kind: output, shape index: {}]  }
   0x1   :  { %v29_v0 = vld [vmem:[%s5888_s0] sm:$0xff]  ;;  %5183 = vset.pattern.permute.xlu1 %v5239_v1  ;;  %5182 = vset.pattern.permute.xlu0 %v5240_v2  ;;  %v30_v3 = vld [vmem:[%s5888_s0 + $0x8] sm:$0xff] }
   0x2   :  { %117 = vperm.xlu1 %5183, %v29_v0   ;;  %66 = vperm.xlu0 %5182, %v29_v0  }
   0x3   :  { %11 = vsyncpa [#allocation4], 0  ;;  %v31_v4 = vld [vmem:[%s5888_s0 + $0x10] sm:$0xff]  ;;  %v32_v5 = vld [vmem:[%s5888_s0 + $0x18] sm:$0xff]  ;;  %vm24_vm0 = vcmask 253952   ;;  %v5241_v10 = vmov 0.0   ;;  %v104_v33 = vlaneseq }
   0x4   :  { %v34_v6 = vld [vmem:[%s5888_s0 + $0x28] sm:$0xff]  ;;  %v35_v7 = vld [vmem:[%s5888_s0 + $0x30] sm:$0xff]  ;;  %v33_v8 = vld [vmem:[%s5888_s0 + $0x20] sm:$0xff]  ;;  %25 = vst.msk [vmem:[#allocation2] sm:$0x1] %vm24_vm0, %v5241_v10  ;;  %vm184_vm1 = vcmask 261120  }
   0x5   :  { %v36_v9 = vld [vmem:[%s5888_s0 + $0x38] sm:$0xff]  ;;  %26 = vst.msk [vmem:[#allocation2 + $0x18] sm:$0x1] %vm24_vm0, %v5241_v10  ;;  %27 = vst.msk [vmem:[#allocation2 + $0x30] sm:$0x1] %vm24_vm0, %v5241_v10  ;;  %v42_v11 = vld [vmem:[%s5890_s2 + $0x20] sm:$0xff] }
   0x6   :  { %121 = vperm.xlu1 %5183, %v30_v3   ;;  %71 = vperm.xlu0 %5182, %v30_v3   ;;  %28 = vst.msk [vmem:[#allocation2 + $0x48] sm:$0x1] %vm24_vm0, %v5241_v10  ;;  %v43_v12 = vld [vmem:[%s5890_s2 + $0x28] sm:$0xff]  ;;  %v342_v13 = vand.u32 4294901760, %v42_v11  ;;  %v44_v16 = vld [vmem:[%s5890_s2 + $0x30] sm:$0xff]  ;;  %v45_v17 = vld [vmem:[%s5890_s2 + $0x38] sm:$0xff] }
   0x7   :  { %v345_v14 = vand.u32 4294901760, %v43_v12  ;;  %v348_v18 = vand.u32 4294901760, %v44_v16  ;;  %v351_v19 = vand.u32 4294901760, %v45_v17  ;;  %v105_v39 = vshrl.u32 %v104_v33, 7  ;;  %v37_v44 = vld [vmem:[%s5889_s1] sm:$0x3] }
   0x8   :  { %v452_v21 = vsub.f32 %v42_v11, %v342_v13  ;;  %vm3970_vm2 = vcmask 257024  }
   0x9   :  { %v5310_v15 = vpack.c.bf16 %v345_v14, %v342_v13  ;;  %v5320_v20 = vpack.c.bf16 %v351_v19, %v348_v18  ;;  %v459_v22 = vsub.f32 %v43_v12, %v345_v14  ;;  %v466_v25 = vsub.f32 %v44_v16, %v348_v18 }
   0xa   :  { %5184 = vset.pattern.permute.xlu1 %v5240_v2  ;;  %76 = vperm.xlu0 %5182, %v31_v4   ;;  %v453_v23 = vand.u32 4294901760, %v452_v21  ;;  %v473_v26 = vsub.f32 %v45_v17, %v351_v19  ;;  %v150_v41 = vsub.s32 1, %v105_v39  ;;  %v106_v42 = vsub.s32 0, %v105_v39 }
   0xb   :  { %81 = vperm.xlu1 %5184, %v32_v5   ;;  %4787 = vmatprep.subr.bf16.mxu0 %v5310_v15  ;;  %v460_v24 = vand.u32 4294901760, %v459_v22  ;;  %v467_v29 = vand.u32 4294901760, %v466_v25  ;;  %v5329_v43 = vpack.c.bf16 %v459_v22, %v452_v21 }
   0xc   :  { %4789 = vmatpush3.bf16.msra.mxu0 %v5310_v15  ;;  %v454_v27 = vsub.f32 %v452_v21, %v453_v23  ;;  %v474_v30 = vand.u32 4294901760, %v473_v26  ;;  %v5334_v45 = vrot.slane %v37_v44, %v150_v41  ;;  %v5336_v46 = vrot.slane %v37_v44, %v106_v42 }
   0xd   :  { %4791 = vmatprep.subr.bf16.mxu0 %v5320_v20  ;;  %v461_v28 = vsub.f32 %v459_v22, %v460_v24  ;;  %v468_v34 = vsub.f32 %v466_v25, %v467_v29  ;;  %v5338_v47 = vpack.c.bf16 %v473_v26, %v466_v25  ;;  %v5344_v63 = vpack.c.bf16 %v460_v24, %v453_v23 }
   0xe   :  { %91 = vperm.xlu0 %5182, %v34_v6   ;;  %v455_v31 = vand.u32 4294901760, %v454_v27  ;;  %v475_v35 = vsub.f32 %v473_v26, %v474_v30 }
   0xf   :  { %5185 = vset.pattern.permute.xlu1 %v5239_v1  ;;  %v462_v32 = vand.u32 4294901760, %v461_v28  ;;  %v469_v37 = vand.u32 4294901760, %v468_v34 }
  0x10   :  { %129 = vperm.xlu1 %5185, %v32_v5   ;;  %4793 = vmatpush3.bf16.msra.mxu0 %v5320_v20  ;;  %v476_v38 = vand.u32 4294901760, %v475_v35 }
  0x11   :  { %v5324_v36 = vpack.c.bf16 %v462_v32, %v455_v31 }
  0x12   :  { %96 = vperm.xlu0 %5182, %v35_v7   ;;  %v5327_v40 = vpack.c.bf16 %v476_v38, %v469_v37 }
  0x13   :  { %4795 = vmatprep.subr.bf16.mxu0 %v5324_v36 }
  0x14   :  { %5186 = vset.pattern.permute.xlu1 %v5240_v2 }
  0x15   :  { %86 = vperm.xlu1 %5186, %v33_v8  }
  0x16   :  { %5188 = vset.pattern.permute.xlu0 %v5239_v1 }
  0x17   :  { %125 = vperm.xlu0 %5188, %v31_v4   ;;  %v5348_v4 = vpack.c.bf16 %v474_v30, %v467_v29 }
  0x19   :  { %5187 = vset.pattern.permute.xlu1 %v5239_v1 }
  0x1a   :  { %133 = vperm.xlu1 %5187, %v33_v8  }
  0x1b   :  { %141 = vperm.xlu0 %5188, %v35_v7  }
  0x1e   :  { %137 = vperm.xlu1 %5187, %v34_v6  }
  0x22   :  { %5189 = vset.pattern.permute.xlu1 %v5240_v2 }
  0x23   :  { %101 = vperm.xlu1 %5189, %v36_v9  }
  0x27   :  { %5190 = vset.pattern.permute.xlu1 %v5239_v1 }
  0x28   :  { %145 = vperm.xlu1 %5190, %v36_v9  }
  0x81   :  { %v118_v48 = vpop.permute.xlu1 %117  ;;  %v67_v49 = vpop.permute.xlu0 %66 }
  0x82   :  { %v152_v50 = vmul.f32 %v5334_v45, %v118_v48  ;;  %v108_v51 = vmul.f32 %v5336_v46, %v67_v49 }
  0x84   :  { %v160_v52 = vadd.f32 %v152_v50, %v108_v51 }
  0x85   :  { %v122_v53 = vpop.permute.xlu1 %121  ;;  %v72_v54 = vpop.permute.xlu0 %71 }
  0x86   :  { %v168_v55 = vmul.f32 0.1, %v160_v52  ;;  %v153_v56 = vmul.f32 %v5334_v45, %v122_v53  ;;  %v109_v57 = vmul.f32 %v5336_v46, %v72_v54 }
  0x88   :  { %v161_v58 = vadd.f32 %v153_v56, %v109_v57  ;;  %v176_v60 = vmax.f32 %v160_v52, %v168_v55 }
  0x89   :  { %v77_v59 = vpop.permute.xlu0 %76 }
  0x8a   :  { %v169_v61 = vmul.f32 0.1, %v161_v58  ;;  %v82_v62 = vpop.permute.xlu1 %81  ;;  %v185_v2 = vsel %vm184_vm1, %v176_v60, 0.0  ;;  %v110_v19 = vmul.f32 %v5336_v46, %v77_v59 }
  0x8b   :  { %v111_v7 = vmul.f32 %v5336_v46, %v82_v62 }
  0x8c   :  { %v177_v0 = vmax.f32 %v161_v58, %v169_v61 }
  0x8d   :  { %v92_v1 = vpop.permute.xlu0 %91 }
  0x8e   :  { %v186_v3 = vsel %vm184_vm1, %v177_v0, 0.0  ;;  %v113_v35 = vmul.f32 %v5336_v46, %v92_v1 }
  0x8f   :  { %v187_v5 = vadd.f32 %v186_v3, %v185_v2  ;;  %v130_v6 = vpop.permute.xlu1 %129 }
  0x90   :  { %v155_v8 = vmul.f32 %v5334_v45, %v130_v6 }
  0x91   :  { %v188_v9 = vrot.slane %v187_v5, 4  ;;  %v97_v10 = vpop.permute.xlu0 %96 }
  0x92   :  { %v163_v11 = vadd.f32 %v155_v8, %v111_v7  ;;  %v114_v53 = vmul.f32 %v5336_v46, %v97_v10 }
  0x93   :  { %v189_v12 = vadd.f32 %v188_v9, %v187_v5 }
  0x94   :  { %v87_v13 = vpop.permute.xlu1 %86  ;;  %v171_v16 = vmul.f32 0.1, %v163_v11 }
  0x95   :  { %v190_v14 = vrot.slane %v189_v12, 2  ;;  %v112_v26 = vmul.f32 %v5336_v46, %v87_v13 }
  0x96   :  { %v126_v17 = vpop.permute.xlu0 %125  ;;  %v179_v25 = vmax.f32 %v163_v11, %v171_v16 }
  0x97   :  { %v191_v18 = vadd.f32 %v190_v14, %v189_v12  ;;  %v154_v21 = vmul.f32 %v5334_v45, %v126_v17 }
  0x98   :  { %v195_v37 = vsel %vm184_vm1, %v179_v25, 0.0 }
  0x99   :  { %v192_v22 = vrot.slane %v191_v18, 1  ;;  %v162_v23 = vadd.f32 %v154_v21, %v110_v19  ;;  %v134_v24 = vpop.permute.xlu1 %133 }
  0x9a   :  { %v156_v27 = vmul.f32 %v5334_v45, %v134_v24  ;;  %v142_v31 = vpop.permute.xlu0 %141 }
  0x9b   :  { %v193_v28 = vadd.f32 %v192_v22, %v191_v18  ;;  %v170_v29 = vmul.f32 0.1, %v162_v23  ;;  %v158_v48 = vmul.f32 %v5334_v45, %v142_v31 }
  0x9c   :  { %v164_v30 = vadd.f32 %v156_v27, %v112_v26 }
  0x9d   :  { %v222_v32 = vmul.f32 0.0625, %v193_v28  ;;  %v178_v33 = vmax.f32 %v162_v23, %v170_v29  ;;  %v138_v34 = vpop.permute.xlu1 %137 }
  0x9e   :  { %v172_v38 = vmul.f32 0.1, %v164_v30  ;;  %v157_v39 = vmul.f32 %v5334_v45, %v138_v34 }
  0x9f   :  { %v5359_v41 = vsub.f32 %v176_v60, %v222_v32  ;;  %v5361_v42 = vsub.f32 %v177_v0, %v222_v32  ;;  %v194_v44 = vsel %vm184_vm1, %v178_v33, 0.0  ;;  %v166_v60 = vadd.f32 %v158_v48, %v114_v53 }
  0xa0   :  { %v196_v49 = vadd.f32 %v195_v37, %v194_v44  ;;  %v165_v50 = vadd.f32 %v157_v39, %v113_v35  ;;  %v180_v55 = vmax.f32 %v164_v30, %v172_v38 }
  0xa1   :  { %v234_v51 = vmul.f32 %v5359_v41, %v5359_v41  ;;  %v235_v52 = vmul.f32 %v5361_v42, %v5361_v42  ;;  %v174_v6 = vmul.f32 0.1, %v166_v60 }
  0xa2   :  { %v197_v54 = vrot.slane %v196_v49, 4  ;;  %v173_v56 = vmul.f32 0.1, %v165_v50  ;;  %v102_v57 = vpop.permute.xlu1 %101  ;;  %v203_v3 = vsel %vm184_vm1, %v180_v55, 0.0 }
  0xa3   :  { %v242_v58 = vsel %vm184_vm1, %v234_v51, 0.0  ;;  %v243_v59 = vsel %vm184_vm1, %v235_v52, 0.0  ;;  %v115_v11 = vmul.f32 %v5336_v46, %v102_v57  ;;  %v182_v18 = vmax.f32 %v166_v60, %v174_v6 }
  0xa4   :  { %v244_v61 = vadd.f32 %v243_v59, %v242_v58  ;;  %v198_v62 = vadd.f32 %v197_v54, %v196_v49  ;;  %v181_v0 = vmax.f32 %v165_v50, %v173_v56 }
  0xa5   :  { %v212_v29 = vsel %vm184_vm1, %v182_v18, 0.0 }
  0xa6   :  { %v245_v1 = vrot.slane %v244_v61, 4  ;;  %v199_v2 = vrot.slane %v198_v62, 2  ;;  %v204_v5 = vsel %vm184_vm1, %v181_v0, 0.0 }
  0xa7   :  { %v205_v7 = vadd.f32 %v204_v5, %v203_v3  ;;  %v146_v8 = vpop.permute.xlu1 %145 }
  0xa8   :  { %v246_v9 = vadd.f32 %v245_v1, %v244_v61  ;;  %v200_v10 = vadd.f32 %v199_v2, %v198_v62  ;;  %v159_v12 = vmul.f32 %v5334_v45, %v146_v8 }
  0xa9   :  { %v206_v13 = vrot.slane %v205_v7, 4 }
  0xaa   :  { %v247_v14 = vrot.slane %v246_v9, 2  ;;  %v201_v16 = vrot.slane %v200_v10, 1  ;;  %v167_v17 = vadd.f32 %v159_v12, %v115_v11 }
  0xab   :  { %v207_v19 = vadd.f32 %v206_v13, %v205_v7 }
  0xac   :  { %v248_v21 = vadd.f32 %v247_v14, %v246_v9  ;;  %v202_v22 = vadd.f32 %v201_v16, %v200_v10  ;;  %v175_v23 = vmul.f32 0.1, %v167_v17 }
  0xad   :  { %v208_v24 = vrot.slane %v207_v19, 2 }
  0xae   :  { %v249_v26 = vrot.slane %v248_v21, 1  ;;  %v223_v27 = vmul.f32 0.0625, %v202_v22  ;;  %v183_v28 = vmax.f32 %v167_v17, %v175_v23 }
  0xaf   :  { %v209_v30 = vadd.f32 %v208_v24, %v207_v19 }
  0xb0   :  { %v250_v31 = vadd.f32 %v249_v26, %v248_v21  ;;  %v5377_v46 = vsub.f32 %v178_v33, %v223_v27  ;;  %v5379_v45 = vsub.f32 %v179_v25, %v223_v27  ;;  %v213_v32 = vsel %vm184_vm1, %v183_v28, 0.0 }
  0xb1   :  { %v210_v34 = vrot.slane %v209_v30, 1  ;;  %v214_v35 = vadd.f32 %v213_v32, %v212_v29 }
  0xb2   :  { %v278_v37 = vmul.f32 0.0625, %v250_v31  ;;  %v236_v38 = vmul.f32 %v5377_v46, %v5377_v46  ;;  %v237_v39 = vmul.f32 %v5379_v45, %v5379_v45 }
  0xb3   :  { %v211_v44 = vadd.f32 %v210_v34, %v209_v30  ;;  %v215_v48 = vrot.slane %v214_v35, 4 }
  0xb4   :  { %v282_v49 = vadd.f32 1e-05, %v278_v37  ;;  %v251_v50 = vsel %vm184_vm1, %v236_v38, 0.0  ;;  %v252_v33 = vsel %vm184_vm1, %v237_v39, 0.0 }
  0xb5   :  { %v253_v25 = vadd.f32 %v252_v33, %v251_v50  ;;  %v224_v51 = vmul.f32 0.0625, %v211_v44  ;;  %v216_v52 = vadd.f32 %v215_v48, %v214_v35 }
  0xb6   :  { %5191 = vrsqrt.f32 %v282_v49 }
  0xb7   :  { %v254_v53 = vrot.slane %v253_v25, 4  ;;  %v5388_v54 = vsub.f32 %v180_v55, %v224_v51  ;;  %v5390_v56 = vsub.f32 %v181_v0, %v224_v51  ;;  %v217_v57 = vrot.slane %v216_v52, 2 }
  0xb9   :  { %v255_v58 = vadd.f32 %v254_v53, %v253_v25  ;;  %v238_v59 = vmul.f32 %v5388_v54, %v5388_v54  ;;  %v239_v60 = vmul.f32 %v5390_v56, %v5390_v56  ;;  %v218_v61 = vadd.f32 %v217_v57, %v216_v52 }
  0xbb   :  { %v256_v62 = vrot.slane %v255_v58, 2  ;;  %v260_v1 = vsel %vm184_vm1, %v238_v59, 0.0  ;;  %v261_v2 = vsel %vm184_vm1, %v239_v60, 0.0  ;;  %v219_v3 = vrot.slane %v218_v61, 1 }
  0xbc   :  { %v262_v5 = vadd.f32 %v261_v2, %v260_v1 }
  0xbd   :  { %v257_v55 = vadd.f32 %v256_v62, %v255_v58  ;;  %v220_v6 = vadd.f32 %v219_v3, %v218_v61 }
  0xbe   :  { %v263_v0 = vrot.slane %v262_v5, 4 }
  0xbf   :  { %v258_v7 = vrot.slane %v257_v55, 1  ;;  %v225_v8 = vmul.f32 0.0625, %v220_v6 }
  0xc0   :  { %v5192_v9 = vpop.eup %5191  ;;  %v264_v10 = vadd.f32 %v263_v0, %v262_v5 }
  0xc1   :  { %v290_v11 = vmul.f32 %v5192_v9, %v5359_v41  ;;  %v291_v12 = vmul.f32 %v5192_v9, %v5361_v42  ;;  %v259_v13 = vadd.f32 %v258_v7, %v257_v55  ;;  %v232_v14 = vsub.f32 %v182_v18, %v225_v8 }
  0xc2   :  { %v265_v16 = vrot.slane %v264_v10, 2  ;;  %v233_v17 = vsub.f32 %v183_v28, %v225_v8 }
  0xc3   :  { %298 = vst.msk [vmem:[#allocation2 + $0x1] sm:$0xff] %vm184_vm1, %v290_v11  ;;  %299 = vst.msk [vmem:[#allocation2 + $0x9] sm:$0xff] %vm184_vm1, %v291_v12  ;;  %v279_v19 = vmul.f32 0.0625, %v259_v13  ;;  %v240_v21 = vmul.f32 %v232_v14, %v232_v14 }
  0xc4   :  { %v266_v22 = vadd.f32 %v265_v16, %v264_v10  ;;  %v241_v23 = vmul.f32 %v233_v17, %v233_v17 }
  0xc5   :  { %v283_v24 = vadd.f32 1e-05, %v279_v19  ;;  %v269_v26 = vsel %vm184_vm1, %v240_v21, 0.0 }
  0xc6   :  { %v267_v27 = vrot.slane %v266_v22, 1  ;;  %v270_v41 = vsel %vm184_vm1, %v241_v23, 0.0  ;;  %v41_v23 = vld [vmem:[%s5890_s2 + $0x18] sm:$0xff] }
  0xc7   :  { %5193 = vrsqrt.f32 %v283_v24  ;;  %v271_v42 = vadd.f32 %v270_v41, %v269_v26 }
  0xc8   :  { %v268_v29 = vadd.f32 %v267_v27, %v266_v22  ;;  %v40_v22 = vld [vmem:[%s5890_s2 + $0x10] sm:$0xff] }
  0xc9   :  { %v272_v18 = vrot.slane %v271_v42, 4 }
  0xca   :  { %v280_v30 = vmul.f32 0.0625, %v268_v29  ;;  %v314_v28 = vld [vmem:[#allocation2 + $0x1] ss:$2 sm:$0xff]  ;;  %v306_v21 = vld [vmem:[#allocation2] ss:$2 sm:$0xff]  ;;  %v974_v29 = vand.u32 4294901760, %v40_v22 }
  0xcb   :  { %v273_v31 = vadd.f32 %v272_v18, %v271_v42  ;;  %v330_v32 = vsel %vm184_vm1, %v314_v28, 0  ;;  %v956_v24 = vsel %vm184_vm1, %v306_v21, 0  ;;  %v977_v18 = vand.u32 4294901760, %v41_v23 }
  0xcc   :  { %v284_v34 = vadd.f32 1e-05, %v280_v30  ;;  %v5405_v35 = vand.u32 4294901760, %v330_v32  ;;  %v5474_v30 = vand.u32 4294901760, %v956_v24 }
  0xcd   :  { %v274_v37 = vrot.slane %v273_v31, 2 }
  0xce   :  { %5195 = vrsqrt.f32 %v284_v34  ;;  %v5408_v38 = vsub.f32 %v330_v32, %v5405_v35 }
  0xcf   :  { %v275_v39 = vadd.f32 %v274_v37, %v273_v31 }
  0xd0   :  { %v412_v44 = vand.u32 4294901760, %v5408_v38 }
  0xd1   :  { %v5194_v48 = vpop.eup %5193  ;;  %v276_v49 = vrot.slane %v275_v39, 1 }
  0xd2   :  { %v292_v50 = vmul.f32 %v5194_v48, %v5377_v46  ;;  %v293_v33 = vmul.f32 %v5194_v48, %v5379_v45  ;;  %v413_v25 = vsub.f32 %v5408_v38, %v412_v44 }
  0xd3   :  { %v277_v51 = vadd.f32 %v276_v49, %v275_v39  ;;  %v5487_v39 = vsub.f32 %v41_v23, %v977_v18 }
  0xd4   :  { %300 = vst.msk [vmem:[#allocation2 + $0x19] sm:$0xff] %vm184_vm1, %v292_v50  ;;  %301 = vst.msk [vmem:[#allocation2 + $0x21] sm:$0xff] %vm184_vm1, %v293_v33  ;;  %v414_v52 = vand.u32 4294901760, %v413_v25 }
  0xd5   :  { %v281_v53 = vmul.f32 0.0625, %v277_v51 }
  0xd6   :  { %4344 = vmatprep.mubr.f32.mxu0 %v414_v52 }
  0xd7   :  { %v285_v57 = vadd.f32 1e-05, %v281_v53 }
  0xd8   :  { %v5196_v58 = vpop.eup %5195 }
  0xd9   :  { %v294_v59 = vmul.f32 %v5196_v58, %v5388_v54  ;;  %v295_v46 = vmul.f32 %v5196_v58, %v5390_v56  ;;  %5197 = vrsqrt.f32 %v285_v57  ;;  %v5521_v58 = vpack.c.bf16 %v977_v18, %v974_v29 }
  0xdb   :  { %302 = vst.msk [vmem:[#allocation2 + $0x31] sm:$0xff] %vm184_vm1, %v294_v59  ;;  %303 = vst.msk [vmem:[#allocation2 + $0x39] sm:$0xff] %vm184_vm1, %v295_v46  ;;  %v316_v45 = vld [vmem:[#allocation2 + $0x19] ss:$2 sm:$0xff]  ;;  %v308_v26 = vld [vmem:[#allocation2 + $0x18] ss:$2 sm:$0xff] }
  0xdc   :  { %v333_v60 = vsel %vm184_vm1, %v316_v45, 0  ;;  %v959_v28 = vsel %vm184_vm1, %v308_v26, 0  ;;  %v324_v21 = vld [vmem:[#allocation2 + $0x1a] ss:$2 sm:$0xff] }
  0xdd   :  { %v5423_v61 = vand.u32 4294901760, %v333_v60  ;;  %v5483_v37 = vand.u32 4294901760, %v959_v28 }
  0xdf   :  { %v421_v62 = vsub.f32 %v333_v60, %v5423_v61  ;;  %v5508_v25 = vsub.f32 %v959_v28, %v5483_v37 }
  0xe1   :  { %v422_v1 = vand.u32 4294901760, %v421_v62  ;;  %v1048_v45 = vand.u32 4294901760, %v5508_v25 }
  0xe2   :  { %v318_v2 = vld [vmem:[#allocation2 + $0x31] ss:$2 sm:$0xff]  ;;  %v310_v42 = vld [vmem:[#allocation2 + $0x30] ss:$2 sm:$0xff] }
  0xe3   :  { %v5198_v3 = vpop.eup %5197  ;;  %v423_v5 = vsub.f32 %v421_v62, %v422_v1  ;;  %v336_v54 = vsel %vm184_vm1, %v318_v2, 0  ;;  %v962_v31 = vsel %vm184_vm1, %v310_v42, 0  ;;  %v1585_v42 = vsel %vm184_vm1, %v324_v21, 0 }
  0xe4   :  { %v296_v55 = vmul.f32 %v5198_v3, %v232_v14  ;;  %v297_v56 = vmul.f32 %v5198_v3, %v233_v17  ;;  %v5427_v6 = vand.u32 4294901760, %v336_v54  ;;  %v5492_v48 = vand.u32 4294901760, %v962_v31 }
  0xe5   :  { %v424_v0 = vand.u32 4294901760, %v423_v5  ;;  %v1049_v3 = vsub.f32 %v5508_v25, %v1048_v45 }
  0xe6   :  { %304 = vst.msk [vmem:[#allocation2 + $0x49] sm:$0xff] %vm184_vm1, %v296_v55  ;;  %305 = vst.msk [vmem:[#allocation2 + $0x51] sm:$0xff] %vm184_vm1, %v297_v56  ;;  %v431_v7 = vsub.f32 %v336_v54, %v5427_v6  ;;  %v5516_v57 = vsub.f32 %v962_v31, %v5492_v48 }
  0xe7   :  { %4345 = vmatmul.mubr.f32.vlgmr.msra.gmra.mrb[0].mxu0 %v424_v0 }
  0xe8   :  { %v432_v8 = vand.u32 4294901760, %v431_v7  ;;  %4797 = vmatpush3.bf16.msra.mxu0 %v5324_v36  ;;  %v38_v36 = vld [vmem:[%s5890_s2] sm:$0xff] }
  0xe9   :  { %4799 = vmatprep.subr.bf16.mxu0 %v5327_v40 }
  0xea   :  { %v433_v9 = vsub.f32 %v431_v7, %v432_v8 }
  0xec   :  { %v434_v10 = vand.u32 4294901760, %v433_v9  ;;  %4801 = vmatpush3.bf16.msra.mxu0 %v5327_v40  ;;  %v39_v40 = vld [vmem:[%s5890_s2 + $0x8] sm:$0xff] }
  0xed   :  { %v320_v11 = vld [vmem:[#allocation2 + $0x49] ss:$2 sm:$0xff]  ;;  %4803 = vmatprep.subr.bf16.mxu0 %v5329_v43  ;;  %v312_v32 = vld [vmem:[#allocation2 + $0x48] ss:$2 sm:$0xff] }
  0xee   :  { %4347 = vmatprep.mubr.f32.mxu0 %v434_v10  ;;  %v339_v12 = vsel %vm184_vm1, %v320_v11, 0  ;;  %v328_v18 = vld [vmem:[#allocation2 + $0x4a] ss:$2 sm:$0xff] }
  0xef   :  { %v5437_v13 = vand.u32 4294901760, %v339_v12 }
  0xf1   :  { %v441_v14 = vsub.f32 %v339_v12, %v5437_v13 }
  0xf3   :  { %v442_v16 = vand.u32 4294901760, %v441_v14 }
  0xf5   :  { %v443_v17 = vsub.f32 %v441_v14, %v442_v16 }
  0xf7   :  { %v444_v19 = vand.u32 4294901760, %v443_v17 }
  0xf9   :  { %4348 = vmatmul.mubr.f32.gmra.mrb[2].mxu0 %v444_v19  ;;  %v322_v19 = vld [vmem:[#allocation2 + $0x2] ss:$2 sm:$0xff] }
  0xfa   :  { %4358 = vmatprep.mubr.f32.mxu0 %v5405_v35 }
  0xfd   :  { %4359 = vmatmul.mubr.f32.vlgmr.msra.gmra.mrb[0].mxu0 %v5423_v61 }
  0xfe   :  { %4805 = vmatpush3.bf16.msra.mxu0 %v5329_v43  ;;  %4361 = vmatprep.mubr.f32.mxu0 %v5427_v6  ;;  %v968_v43 = vand.u32 4294901760, %v38_v36 }
  0xff   :  { %4807 = vmatprep.subr.bf16.mxu0 %v5338_v47 }
 0x100   :  { %v5469_v27 = vsub.f32 %v38_v36, %v968_v43 }
 0x101   :  { %4362 = vmatmul.mubr.f32.gmra.mrb[2].mxu0 %v5437_v13 }
 0x102   :  { %4809 = vmatpush3.bf16.msra.mxu0 %v5338_v47  ;;  %4372 = vmatprep.mubr.f32.mxu0 %v5408_v38  ;;  %v971_v47 = vand.u32 4294901760, %v39_v40  ;;  %v5485_v38 = vsub.f32 %v40_v22, %v974_v29 }
 0x103   :  { %4811 = vmatprep.subr.bf16.mxu0 %v5310_v15 }
 0x104   :  { %v5471_v41 = vsub.f32 %v39_v40, %v971_v47  ;;  %v5498_v49 = vpack.c.bf16 %v971_v47, %v968_v43  ;;  %v1093_v51 = vand.u32 4294901760, %v5485_v38  ;;  %v4854_v11 = vpack.c.bf16 %v5487_v39, %v5485_v38  ;;  %v48_v40 = vld [vmem:[%s5890_s2 + $0x50] sm:$0xff]  ;;  %v49_v43 = vld [vmem:[%s5890_s2 + $0x58] sm:$0xff] }
 0x105   :  { %4373 = vmatmul.mubr.f32.vlgmr.msra.gmra.mrb[0].mxu0 %v421_v62  ;;  %v1582_v47 = vsel %vm184_vm1, %v322_v19, 0  ;;  %v1600_v26 = vand.u32 4294901760, %v48_v40 }
 0x106   :  { %4813 = vmatpush3.bf16.msra.mxu0 %v5310_v15  ;;  %4375 = vmatprep.mubr.f32.mxu0 %v431_v7  ;;  %v1086_v34 = vand.u32 4294901760, %v5471_v41  ;;  %v1094_v60 = vsub.f32 %v5485_v38, %v1093_v51  ;;  %v4850_v10 = vpack.c.bf16 %v5471_v41, %v5469_v27 }
 0x107   :  { %4815 = vmatprep.subr.bf16.mxu0 %v5320_v20 }
 0x108   :  { %v1087_v33 = vsub.f32 %v5471_v41, %v1086_v34  ;;  %v1095_v5 = vand.u32 4294901760, %v1094_v60  ;;  %v5587_v41 = vand.u32 4294901760, %v1582_v47 }
 0x109   :  { %4376 = vmatmul.mubr.f32.gmra.mrb[2].mxu0 %v441_v14  ;;  %v47_v14 = vld [vmem:[%s5890_s2 + $0x48] sm:$0xff] }
 0x10a   :  { %4817 = vmatpush3.bf16.msra.mxu0 %v5320_v20  ;;  %4386 = vmatprep.mubr.f32.mxu0 %v412_v44  ;;  %v5490_v44 = vsub.f32 %v956_v24, %v5474_v30  ;;  %v1088_v46 = vand.u32 4294901760, %v1087_v33  ;;  %v1597_v17 = vand.u32 4294901760, %v47_v14  ;;  %v326_v24 = vld [vmem:[#allocation2 + $0x32] ss:$2 sm:$0xff]  ;;  %v5602_v38 = vsub.f32 %v1582_v47, %v5587_v41 }
 0x10b   :  { %4819 = vmatprep.subr.bf16.mxu0 %v5344_v63  ;;  %v1588_v29 = vsel %vm184_vm1, %v326_v24, 0 }
 0x10c   :  { %v1038_v53 = vand.u32 4294901760, %v5490_v44  ;;  %v5585_v23 = vsub.f32 %v47_v14, %v1597_v17 }
 0x10d   :  { %4387 = vmatmul.mubr.f32.vlgmr.msra.gmra.mrb[0].mxu0 %v422_v1  ;;  %v1058_v1 = vand.u32 4294901760, %v5516_v57 }
 0x10e   :  { %4821 = vmatpush3.bf16.msra.mxu0 %v5344_v63  ;;  %4389 = vmatprep.mubr.f32.mxu0 %v432_v8  ;;  %v1079_v63 = vand.u32 4294901760, %v5469_v27  ;;  %v1712_v31 = vand.u32 4294901760, %v5585_v23 }
 0x10f   :  { %4823 = vmatprep.subr.bf16.mxu0 %v5348_v4  ;;  %v1059_v0 = vsub.f32 %v5516_v57, %v1058_v1 }
 0x110   :  { %v1080_v50 = vsub.f32 %v5469_v27, %v1079_v63  ;;  %v4866_v12 = vpack.c.bf16 %v1086_v34, %v1079_v63  ;;  %v1603_v27 = vand.u32 4294901760, %v49_v43  ;;  %v5597_v63 = vsub.f32 %v48_v40, %v1600_v26 }
 0x111   :  { %4390 = vmatmul.mubr.f32.gmra.mrb[2].mxu0 %v442_v16  ;;  %v1060_v8 = vand.u32 4294901760, %v1059_v0  ;;  %v1713_v33 = vsub.f32 %v5585_v23, %v1712_v31 }
 0x112   :  { %4825 = vmatpush3.bf16.msra.mxu0 %v5348_v4  ;;  %4400 = vmatprep.mubr.f32.mxu0 %v5405_v35  ;;  %v965_v4 = vsel %vm184_vm1, %v312_v32, 0  ;;  %v1081_v59 = vand.u32 4294901760, %v1080_v50  ;;  %v5595_v32 = vand.u32 4294901760, %v1585_v42  ;;  %v5599_v34 = vsub.f32 %v49_v43, %v1603_v27 }
 0x113   :  { %4827 = vmatprep.subr.bf16.mxu0 %v5310_v15  ;;  %v5512_v52 = vand.u32 4294901760, %v965_v4 }
 0x114   :  { %v4842_v2 = vpack.c.bf16 %v1088_v46, %v1081_v59  ;;  %v5633_v59 = vpack.c.bf16 %v1603_v27, %v1600_v26 }
 0x115   :  { %4401 = vmatmul.mubr.f32.vlgmr.msra.gmra.mrb[0].mxu0 %v5423_v61 }
 0x116   :  { %4829 = vmatpush3.bf16.msra.mxu0 %v5310_v15  ;;  %4403 = vmatprep.mubr.f32.mxu0 %v5427_v6  ;;  %v1100_v15 = vand.u32 4294901760, %v5487_v39 }
 0x117   :  { %4831 = vmatprep.subr.bf16.mxu0 %v5320_v20 }
 0x118   :  { %v1101_v62 = vsub.f32 %v5487_v39, %v1100_v15  ;;  %v4870_v36 = vpack.c.bf16 %v1100_v15, %v1093_v51  ;;  %v5604_v39 = vand.u32 4294901760, %v1588_v29  ;;  %v1719_v51 = vand.u32 4294901760, %v5597_v63 }
 0x119   :  { %4404 = vmatmul.mubr.f32.gmra.mrb[2].mxu0 %v5437_v13 }
 0x11a   :  { %4833 = vmatpush3.bf16.msra.mxu0 %v5320_v20  ;;  %4414 = vmatprep.mubr.f32.mxu0 %v5405_v35  ;;  %v5532_v20 = vsub.f32 %v965_v4, %v5512_v52  ;;  %v1039_v35 = vsub.f32 %v5490_v44, %v1038_v53  ;;  %v1102_v54 = vand.u32 4294901760, %v1101_v62  ;;  %v1720_v62 = vsub.f32 %v5597_v63, %v1719_v51 }
 0x11b   :  { %4835 = vmatprep.subr.bf16.mxu0 %v5498_v49 }
 0x11c   :  { %v1068_v55 = vand.u32 4294901760, %v5532_v20  ;;  %v1040_v56 = vand.u32 4294901760, %v1039_v35 }
 0x11d   :  { %4415 = vmatmul.mubr.f32.vlgmr.msra.gmra.mrb[0].mxu0 %v5423_v61  ;;  %v1050_v61 = vand.u32 4294901760, %v1049_v3  ;;  %v1721_v3 = vand.u32 4294901760, %v1720_v62 }
 0x11e   :  { %4837 = vmatpush3.bf16.msra.mxu0 %v5498_v49  ;;  %4417 = vmatprep.mubr.f32.mxu0 %v5427_v6  ;;  %v4846_v6 = vpack.c.bf16 %v1102_v54, %v1095_v5  ;;  %v1069_v7 = vsub.f32 %v5532_v20, %v1068_v55 }
 0x11f   :  { %4839 = vmatprep.subr.bf16.mxu0 %v5521_v58 }
 0x120   :  { %v1070_v9 = vand.u32 4294901760, %v1069_v7 }
 0x121   :  { %4418 = vmatmul.mubr.f32.gmra.mrb[2].mxu0 %v5437_v13  ;;  %v46_v13 = vld [vmem:[%s5890_s2 + $0x40] sm:$0xff] }
 0x122   :  { %4841 = vmatpush3.bf16.msra.mxu0 %v5521_v58  ;;  %4428 = vmatprep.mubr.f32.mxu0 %v1040_v56  ;;  %v1594_v16 = vand.u32 4294901760, %v46_v13 }
 0x123   :  { %4843 = vmatprep.subr.bf16.mxu0 %v4842_v2 }
 0x124   :  { %v5583_v22 = vsub.f32 %v46_v13, %v1594_v16  ;;  %v5610_v4 = vpack.c.bf16 %v1597_v17, %v1594_v16  ;;  %v58_v16 = vld [vmem:[%s5892_s4 + $0x38] sm:$0xff] }
 0x125   :  { %4429 = vmatmul.mubr.f32.vlgmr.msra.gmra.mrb[0].mxu0 %v1050_v61  ;;  %v2350_v19 = vand.u32 4294901760, %v58_v16 }
 0x126   :  { %4845 = vmatpush3.bf16.msra.mxu0 %v4842_v2  ;;  %4431 = vmatprep.mubr.f32.mxu0 %v1060_v8  ;;  %v1705_v28 = vand.u32 4294901760, %v5583_v22  ;;  %v4898_v7 = vpack.c.bf16 %v5585_v23, %v5583_v22 }
 0x127   :  { %4847 = vmatprep.subr.bf16.mxu0 %v4846_v6  ;;  %v2452_v27 = vsub.f32 %v58_v16, %v2350_v19 }
 0x128   :  { %v1706_v50 = vsub.f32 %v5583_v22, %v1705_v28  ;;  %v4914_v8 = vpack.c.bf16 %v1712_v31, %v1705_v28 }
 0x129   :  { %4432 = vmatmul.mubr.f32.gmra.mrb[2].mxu0 %v1070_v9 }
 0x12a   :  { %4849 = vmatpush3.bf16.msra.mxu0 %v4846_v6  ;;  %4442 = vmatprep.mubr.f32.mxu0 %v5474_v30  ;;  %v1707_v46 = vand.u32 4294901760, %v1706_v50 }
 0x12b   :  { %4851 = vmatprep.subr.bf16.mxu0 %v4850_v10 }
 0x12d   :  { %4443 = vmatmul.mubr.f32.vlgmr.msra.gmra.mrb[0].mxu0 %v5483_v37 }
 0x12e   :  { %4853 = vmatpush3.bf16.msra.mxu0 %v4850_v10  ;;  %4445 = vmatprep.mubr.f32.mxu0 %v5492_v48  ;;  %v55_v10 = vld [vmem:[%s5892_s4 + $0x20] sm:$0xff] }
 0x12f   :  { %4855 = vmatprep.subr.bf16.mxu0 %v4854_v11  ;;  %v2341_v13 = vand.u32 4294901760, %v55_v10 }
 0x131   :  { %4446 = vmatmul.mubr.f32.gmra.mrb[2].mxu0 %v5512_v52  ;;  %v2431_v43 = vsub.f32 %v55_v10, %v2341_v13 }
 0x132   :  { %4857 = vmatpush3.bf16.msra.mxu0 %v4854_v11  ;;  %4456 = vmatprep.mubr.f32.mxu0 %v5490_v44  ;;  %v1591_v44 = vsel %vm184_vm1, %v328_v18, 0  ;;  %v56_v11 = vld [vmem:[%s5892_s4 + $0x28] sm:$0xff]  ;;  %v2453_v18 = vand.u32 4294901760, %v2452_v27 }
 0x133   :  { %4859 = vmatprep.subr.bf16.mxu0 %v5498_v49  ;;  %v5624_v15 = vand.u32 4294901760, %v1591_v44  ;;  %v2344_v14 = vand.u32 4294901760, %v56_v11  ;;  %v2432_v21 = vand.u32 4294901760, %v2431_v43 }
 0x135   :  { %4457 = vmatmul.mubr.f32.vlgmr.msra.gmra.mrb[0].mxu0 %v5508_v25  ;;  %v5620_v25 = vsub.f32 %v1585_v42, %v5595_v32  ;;  %v2438_v47 = vsub.f32 %v56_v11, %v2344_v14  ;;  %v2433_v23 = vsub.f32 %v2431_v43, %v2432_v21 }
 0x136   :  { %4861 = vmatpush3.bf16.msra.mxu0 %v5498_v49  ;;  %4459 = vmatprep.mubr.f32.mxu0 %v5516_v57  ;;  %v5628_v57 = vsub.f32 %v1588_v29, %v5604_v39 }
 0x137   :  { %4863 = vmatprep.subr.bf16.mxu0 %v5521_v58  ;;  %v1674_v60 = vand.u32 4294901760, %v5620_v25  ;;  %v2439_v22 = vand.u32 4294901760, %v2438_v47 }
 0x138   :  { %v1684_v35 = vand.u32 4294901760, %v5628_v57 }
 0x139   :  { %4460 = vmatmul.mubr.f32.gmra.mrb[2].mxu0 %v5532_v20  ;;  %v1675_v2 = vsub.f32 %v5620_v25, %v1674_v60  ;;  %v2440_v24 = vsub.f32 %v2438_v47, %v2439_v22 }
 0x13a   :  { %4865 = vmatpush3.bf16.msra.mxu0 %v5521_v58  ;;  %4470 = vmatprep.mubr.f32.mxu0 %v1038_v53  ;;  %v1664_v53 = vand.u32 4294901760, %v5602_v38  ;;  %v1685_v56 = vsub.f32 %v5628_v57, %v1684_v35 }
 0x13b   :  { %4867 = vmatprep.subr.bf16.mxu0 %v4866_v12  ;;  %v2441_v42 = vand.u32 4294901760, %v2440_v24 }
 0x13c   :  { %v1686_v61 = vand.u32 4294901760, %v1685_v56 }
 0x13d   :  { %4471 = vmatmul.mubr.f32.vlgmr.msra.gmra.mrb[0].mxu0 %v1048_v45  ;;  %v1714_v45 = vand.u32 4294901760, %v1713_v33  ;;  %v4082_v33 = vld [vmem:[%s5891_s3] ss:$0 sm:$0xff] }
 0x13e   :  { %4869 = vmatpush3.bf16.msra.mxu0 %v4866_v12  ;;  %4473 = vmatprep.mubr.f32.mxu0 %v1058_v1  ;;  %v57_v12 = vld [vmem:[%s5892_s4 + $0x30] sm:$0xff] }
 0x13f   :  { %4871 = vmatprep.subr.bf16.mxu0 %v4870_v36  ;;  %v4890_v1 = vpack.c.bf16 %v1714_v45, %v1707_v46  ;;  %v2347_v17 = vand.u32 4294901760, %v57_v12 }
 0x141   :  { %4474 = vmatmul.mubr.f32.gmra.mrb[2].mxu0 %v1068_v55  ;;  %v5703_v40 = vpack.c.bf16 %v2350_v19, %v2347_v17  ;;  %v2445_v26 = vsub.f32 %v57_v12, %v2347_v17 }
 0x142   :  { %4873 = vmatpush3.bf16.msra.mxu0 %v4870_v36  ;;  %4484 = vmatprep.mubr.f32.mxu0 %v5474_v30  ;;  %v5701_v36 = vpack.c.bf16 %v2344_v14, %v2341_v13 }
 0x143   :  { %4875 = vmatprep.subr.bf16.mxu0 %v5498_v49  ;;  %v2446_v29 = vand.u32 4294901760, %v2445_v26 }
 0x144   :  { %4931 = vmatprep.subr.bf16.mxu1 %v5701_v36 }
 0x145   :  { %4485 = vmatmul.mubr.f32.vlgmr.msra.gmra.mrb[0].mxu0 %v5483_v37  ;;  %4933 = vmatpush3.bf16.msra.mxu1 %v5701_v36  ;;  %v2447_v31 = vsub.f32 %v2445_v26, %v2446_v29  ;;  %v5720_v50 = vpack.c.bf16 %v2453_v18, %v2446_v29 }
 0x146   :  { %4877 = vmatpush3.bf16.msra.mxu0 %v5498_v49  ;;  %4487 = vmatprep.mubr.f32.mxu0 %v5492_v48  ;;  %v1726_v49 = vand.u32 4294901760, %v5599_v34 }
 0x147   :  { %4879 = vmatprep.subr.bf16.mxu0 %v5521_v58  ;;  %4935 = vmatprep.subr.bf16.mxu1 %v5703_v40 }
 0x148   :  { %v1727_v20 = vsub.f32 %v5599_v34, %v1726_v49  ;;  %v4918_v9 = vpack.c.bf16 %v1726_v49, %v1719_v51 }
 0x149   :  { %4488 = vmatmul.mubr.f32.gmra.mrb[2].mxu0 %v5512_v52  ;;  %4937 = vmatpush3.bf16.msra.mxu1 %v5703_v40 }
 0x14a   :  { %4881 = vmatpush3.bf16.msra.mxu0 %v5521_v58  ;;  %4498 = vmatprep.mubr.f32.mxu0 %v5474_v30  ;;  %v1693_v58 = vsub.f32 %v1591_v44, %v5624_v15  ;;  %v1665_v30 = vsub.f32 %v5602_v38, %v1664_v53  ;;  %v1728_v5 = vand.u32 4294901760, %v1727_v20  ;;  %v5716_v44 = vpack.c.bf16 %v2452_v27, %v2445_v26 }
 0x14b   :  { %4883 = vmatprep.subr.bf16.mxu0 %v5610_v4 }
 0x14c   :  { %v1694_v54 = vand.u32 4294901760, %v1693_v58  ;;  %v1666_v55 = vand.u32 4294901760, %v1665_v30  ;;  %v4894_v0 = vpack.c.bf16 %v1728_v5, %v1721_v3 }
 0x14d   :  { %4499 = vmatmul.mubr.f32.vlgmr.msra.gmra.mrb[0].mxu0 %v5483_v37  ;;  %v1676_v37 = vand.u32 4294901760, %v1675_v2 }
 0x14e   :  { %4885 = vmatpush3.bf16.msra.mxu0 %v5610_v4  ;;  %4501 = vmatprep.mubr.f32.mxu0 %v5492_v48  ;;  %v1695_v48 = vsub.f32 %v1693_v58, %v1694_v54 }
 0x14f   :  { %4887 = vmatprep.subr.bf16.mxu0 %v5633_v59 }
 0x150   :  { %v1696_v6 = vand.u32 4294901760, %v1695_v48 }
 0x151   :  { %4502 = vmatmul.mubr.f32.gmra.mrb[2].mxu0 %v5512_v52  ;;  %v4902_v52 = vpack.c.bf16 %v5599_v34, %v5597_v63  ;;  %v2448_v63 = vand.u32 4294901760, %v2447_v31 }
 0x152   :  { %4889 = vmatpush3.bf16.msra.mxu0 %v5633_v59  ;;  %4512 = vmatprep.mubr.f32.mxu0 %v1666_v55 }
 0x153   :  { %4891 = vmatprep.subr.bf16.mxu0 %v4890_v1 }
 0x155   :  { %4513 = vmatmul.mubr.f32.vlgmr.msra.gmra.mrb[0].mxu0 %v1676_v37 }
 0x156   :  { %4893 = vmatpush3.bf16.msra.mxu0 %v4890_v1  ;;  %4515 = vmatprep.mubr.f32.mxu0 %v1686_v61 }
 0x157   :  { %4895 = vmatprep.subr.bf16.mxu0 %v4894_v0 }
 0x159   :  { %4516 = vmatmul.mubr.f32.gmra.mrb[2].mxu0 %v1696_v6 }
 0x15a   :  { %4897 = vmatpush3.bf16.msra.mxu0 %v4894_v0  ;;  %4526 = vmatprep.mubr.f32.mxu0 %v5587_v41 }
 0x15b   :  { %4899 = vmatprep.subr.bf16.mxu0 %v4898_v7 }
 0x15d   :  { %4527 = vmatmul.mubr.f32.vlgmr.msra.gmra.mrb[0].mxu0 %v5595_v32 }
 0x15e   :  { %4901 = vmatpush3.bf16.msra.mxu0 %v4898_v7  ;;  %4529 = vmatprep.mubr.f32.mxu0 %v5604_v39 }
 0x15f   :  { %4903 = vmatprep.subr.bf16.mxu0 %v4902_v52 }
 0x161   :  { %4530 = vmatmul.mubr.f32.gmra.mrb[2].mxu0 %v5624_v15 }
 0x162   :  { %4905 = vmatpush3.bf16.msra.mxu0 %v4902_v52  ;;  %4540 = vmatprep.mubr.f32.mxu0 %v5602_v38 }
 0x163   :  { %4907 = vmatprep.subr.bf16.mxu0 %v5610_v4 }
 0x165   :  { %4541 = vmatmul.mubr.f32.vlgmr.msra.gmra.mrb[0].mxu0 %v5620_v25 }
 0x166   :  { %4909 = vmatpush3.bf16.msra.mxu0 %v5610_v4  ;;  %4543 = vmatprep.mubr.f32.mxu0 %v5628_v57 }
 0x167   :  { %4911 = vmatprep.subr.bf16.mxu0 %v5633_v59 }
 0x169   :  { %4544 = vmatmul.mubr.f32.gmra.mrb[2].mxu0 %v1693_v58 }
 0x16a   :  { %4913 = vmatpush3.bf16.msra.mxu0 %v5633_v59  ;;  %4554 = vmatprep.mubr.f32.mxu0 %v1664_v53 }
 0x16b   :  { %4915 = vmatprep.subr.bf16.mxu0 %v4914_v8 }
 0x16d   :  { %4555 = vmatmul.mubr.f32.vlgmr.msra.gmra.mrb[0].mxu0 %v1674_v60 }
 0x16e   :  { %4917 = vmatpush3.bf16.msra.mxu0 %v4914_v8  ;;  %4557 = vmatprep.mubr.f32.mxu0 %v1684_v35 }
 0x16f   :  { %4919 = vmatprep.subr.bf16.mxu0 %v4918_v9 }
 0x171   :  { %4558 = vmatmul.mubr.f32.gmra.mrb[2].mxu0 %v1694_v54 }
 0x172   :  { %4921 = vmatpush3.bf16.msra.mxu0 %v4918_v9  ;;  %4568 = vmatprep.mubr.f32.mxu0 %v5587_v41 }
 0x173   :  { %4923 = vmatprep.subr.bf16.mxu0 %v5610_v4 }
 0x175   :  { %4569 = vmatmul.mubr.f32.vlgmr.msra.gmra.mrb[0].mxu0 %v5595_v32 }
 0x176   :  { %4925 = vmatpush3.bf16.msra.mxu0 %v5610_v4  ;;  %4571 = vmatprep.mubr.f32.mxu0 %v5604_v39  ;;  %v5718_v4 = vpack.c.bf16 %v2439_v22, %v2432_v21 }
 0x177   :  { %4927 = vmatprep.subr.bf16.mxu0 %v5633_v59 }
 0x179   :  { %4572 = vmatmul.mubr.f32.gmra.mrb[2].mxu0 %v5624_v15 }
 0x17a   :  { %4929 = vmatpush3.bf16.msra.mxu0 %v5633_v59  ;;  %4582 = vmatprep.mubr.f32.mxu0 %v5587_v41  ;;  %v2434_v41 = vand.u32 4294901760, %v2433_v23 }
 0x17c   :  { %v5709_v28 = vpack.c.bf16 %v2441_v42, %v2434_v41 }
 0x17d   :  { %4583 = vmatmul.mubr.f32.vlgmr.msra.gmra.mrb[0].mxu0 %v5595_v32  ;;  %v2454_v32 = vsub.f32 %v2452_v27, %v2453_v18 }
 0x17e   :  { %4585 = vmatprep.mubr.f32.mxu0 %v5604_v39  ;;  %4939 = vmatprep.subr.bf16.mxu1 %v5709_v28  ;;  %v5714_v39 = vpack.c.bf16 %v2438_v47, %v2431_v43 }
 0x17f   :  { %v2455_v34 = vand.u32 4294901760, %v2454_v32 }
 0x181   :  { %4586 = vmatmul.mubr.f32.gmra.mrb[2].mxu0 %v5624_v15  ;;  %v5712_v38 = vpack.c.bf16 %v2455_v34, %v2448_v63 }
 0x250   :  { %v4584_v25 = vpop.f32.mrb[0].mxu0 }
 0x251   :  { %v2218_v51 = vadd.f32 %v4584_v25, %v4082_v33  ;;  %v2185_v49 = vpop.f32.mrb[1].mxu0 }
 0x252   :  { %v2217_v15 = vadd.f32 %v4082_v33, %v2185_v49 }
 0x253   :  { %v2222_v53 = vmul.f32 0.1, %v2218_v51 }
 0x254   :  { %v2221_v57 = vmul.f32 0.1, %v2217_v15  ;;  %v4587_v59 = vpop.f32.mrb[2].mxu0 }
 0x255   :  { %v2226_v46 = vmax.f32 %v2218_v51, %v2222_v53  ;;  %v2220_v45 = vadd.f32 %v4587_v59, %v4082_v33  ;;  %v2197_v60 = vpop.f32.mrb[3].mxu0 }
 0x256   :  { %v2225_v62 = vmax.f32 %v2217_v15, %v2221_v57  ;;  %v2219_v20 = vadd.f32 %v4082_v33, %v2197_v60 }
 0x257   :  { %v2236_v58 = vsel %vm184_vm1, %v2226_v46, 0.0  ;;  %v2224_v30 = vmul.f32 0.1, %v2220_v45 }
 0x258   :  { %v2237_v35 = vrot.slane %v2236_v58, 4  ;;  %v2229_v1 = vsel %vm184_vm1, %v2225_v62, 0.0  ;;  %v2223_v2 = vmul.f32 0.1, %v2219_v20 }
 0x259   :  { %v2230_v3 = vrot.slane %v2229_v1, 4  ;;  %v2228_v5 = vmax.f32 %v2220_v45, %v2224_v30 }
 0x25a   :  { %v2238_v54 = vadd.f32 %v2237_v35, %v2236_v58  ;;  %v2227_v55 = vmax.f32 %v2219_v20, %v2223_v2 }
 0x25b   :  { %v2231_v56 = vadd.f32 %v2230_v3, %v2229_v1  ;;  %v2250_v37 = vsel %vm184_vm1, %v2228_v5, 0.0 }
 0x25c   :  { %v2239_v0 = vrot.slane %v2238_v54, 2  ;;  %v2251_v48 = vrot.slane %v2250_v37, 4  ;;  %v2243_v61 = vsel %vm184_vm1, %v2227_v55, 0.0 }
 0x25d   :  { %v2232_v6 = vrot.slane %v2231_v56, 2  ;;  %v2244_v7 = vrot.slane %v2243_v61, 4 }
 0x25e   :  { %v2240_v52 = vadd.f32 %v2239_v0, %v2238_v54  ;;  %v2252_v8 = vadd.f32 %v2251_v48, %v2250_v37 }
 0x25f   :  { %v2233_v9 = vadd.f32 %v2232_v6, %v2231_v56  ;;  %v2245_v10 = vadd.f32 %v2244_v7, %v2243_v61 }
 0x260   :  { %v2241_v11 = vrot.slane %v2240_v52, 1  ;;  %v2253_v12 = vrot.slane %v2252_v8, 2 }
 0x261   :  { %v2234_v13 = vrot.slane %v2233_v9, 1  ;;  %v2246_v14 = vrot.slane %v2245_v10, 2 }
 0x262   :  { %v2242_v16 = vadd.f32 %v2241_v11, %v2240_v52  ;;  %v2254_v17 = vadd.f32 %v2253_v12, %v2252_v8 }
 0x263   :  { %v2235_v19 = vadd.f32 %v2234_v13, %v2233_v9  ;;  %v2247_v43 = vadd.f32 %v2246_v14, %v2245_v10 }
 0x264   :  { %v2259_v47 = vmul.f32 0.125, %v2242_v16  ;;  %v2255_v21 = vrot.slane %v2254_v17, 1 }
 0x265   :  { %v2258_v22 = vmul.f32 0.125, %v2235_v19  ;;  %v2248_v23 = vrot.slane %v2247_v43, 1 }
 0x266   :  { %v2263_v24 = vsub.f32 %v2226_v46, %v2259_v47  ;;  %v2256_v26 = vadd.f32 %v2255_v21, %v2254_v17 }
 0x267   :  { %v2262_v27 = vsub.f32 %v2225_v62, %v2258_v22  ;;  %v2249_v41 = vadd.f32 %v2248_v23, %v2247_v43 }
 0x268   :  { %v2267_v42 = vmul.f32 %v2263_v24, %v2263_v24  ;;  %v2261_v29 = vmul.f32 0.125, %v2256_v26 }
 0x269   :  { %v2266_v18 = vmul.f32 %v2262_v27, %v2262_v27  ;;  %v2260_v31 = vmul.f32 0.125, %v2249_v41 }
 0x26a   :  { %v2277_v32 = vsel %vm184_vm1, %v2267_v42, 0.0  ;;  %v2265_v63 = vsub.f32 %v2228_v5, %v2261_v29 }
 0x26b   :  { %v2278_v34 = vrot.slane %v2277_v32, 4  ;;  %v2270_v33 = vsel %vm184_vm1, %v2266_v18, 0.0  ;;  %v2264_v25 = vsub.f32 %v2227_v55, %v2260_v31 }
 0x26c   :  { %v2271_v51 = vrot.slane %v2270_v33, 4  ;;  %v2269_v49 = vmul.f32 %v2265_v63, %v2265_v63 }
 0x26d   :  { %v2279_v15 = vadd.f32 %v2278_v34, %v2277_v32  ;;  %v2268_v53 = vmul.f32 %v2264_v25, %v2264_v25 }
 0x26e   :  { %v2272_v57 = vadd.f32 %v2271_v51, %v2270_v33  ;;  %v2291_v59 = vsel %vm184_vm1, %v2269_v49, 0.0 }
 0x26f   :  { %v2280_v46 = vrot.slane %v2279_v15, 2  ;;  %v2292_v45 = vrot.slane %v2291_v59, 4  ;;  %v2284_v60 = vsel %vm184_vm1, %v2268_v53, 0.0 }
 0x270   :  { %v2273_v62 = vrot.slane %v2272_v57, 2  ;;  %v2285_v20 = vrot.slane %v2284_v60, 4 }
 0x271   :  { %v2281_v58 = vadd.f32 %v2280_v46, %v2279_v15  ;;  %v2293_v30 = vadd.f32 %v2292_v45, %v2291_v59 }
 0x272   :  { %v2274_v35 = vadd.f32 %v2273_v62, %v2272_v57  ;;  %v2286_v1 = vadd.f32 %v2285_v20, %v2284_v60 }
 0x273   :  { %v2282_v2 = vrot.slane %v2281_v58, 1  ;;  %v2294_v3 = vrot.slane %v2293_v30, 2 }
 0x274   :  { %v2275_v5 = vrot.slane %v2274_v35, 1  ;;  %v2287_v54 = vrot.slane %v2286_v1, 2 }
 0x275   :  { %v2283_v55 = vadd.f32 %v2282_v2, %v2281_v58  ;;  %v2295_v56 = vadd.f32 %v2294_v3, %v2293_v30  ;;  %v53_v30 = vld [vmem:[%s5892_s4 + $0x10] sm:$0xff] }
 0x276   :  { %v2276_v37 = vadd.f32 %v2275_v5, %v2274_v35  ;;  %v2288_v0 = vadd.f32 %v2287_v54, %v2286_v1  ;;  %v54_v35 = vld [vmem:[%s5892_s4 + $0x18] sm:$0xff]  ;;  %v2885_v3 = vand.u32 4294901760, %v53_v30 }
 0x277   :  { %v2299_v48 = vmul.f32 0.125, %v2283_v55  ;;  %v2296_v61 = vrot.slane %v2295_v56, 1  ;;  %v2888_v5 = vand.u32 4294901760, %v54_v35 }
 0x278   :  { %v2298_v6 = vmul.f32 0.125, %v2276_v37  ;;  %v2289_v7 = vrot.slane %v2288_v0, 1 }
 0x279   :  { %v2303_v52 = vadd.f32 1e-05, %v2299_v48  ;;  %v2297_v8 = vadd.f32 %v2296_v61, %v2295_v56  ;;  %v5789_v48 = vsub.f32 %v53_v30, %v2885_v3  ;;  %v5791_v61 = vsub.f32 %v54_v35, %v2888_v5 }
 0x27a   :  { %v2302_v9 = vadd.f32 1e-05, %v2298_v6  ;;  %v2290_v10 = vadd.f32 %v2289_v7, %v2288_v0 }
 0x27b   :  { %5199 = vrsqrt.f32 %v2303_v52  ;;  %v2301_v11 = vmul.f32 0.125, %v2297_v8 }
 0x27c   :  { %5201 = vrsqrt.f32 %v2302_v9  ;;  %v2300_v12 = vmul.f32 0.125, %v2290_v10  ;;  %v2984_v9 = vand.u32 4294901760, %v5789_v48  ;;  %v2991_v10 = vand.u32 4294901760, %v5791_v61 }
 0x27d   :  { %v2305_v13 = vadd.f32 1e-05, %v2301_v11 }
 0x27e   :  { %v2304_v14 = vadd.f32 1e-05, %v2300_v12 }
 0x27f   :  { %5203 = vrsqrt.f32 %v2305_v13 }
 0x280   :  { %5205 = vrsqrt.f32 %v2304_v14 }
 0x285   :  { %v5200_v16 = vpop.eup %5199 }
 0x286   :  { %v5202_v17 = vpop.eup %5201  ;;  %v2311_v19 = vmul.f32 %v5200_v16, %v2263_v24  ;;  %v2985_v16 = vsub.f32 %v5789_v48, %v2984_v9 }
 0x287   :  { %v2310_v43 = vmul.f32 %v5202_v17, %v2262_v27  ;;  %v2992_v17 = vsub.f32 %v5791_v61, %v2991_v10 }
 0x288   :  { %2315 = vst.msk [vmem:[#allocation2 + $0x19] sm:$0xff] %vm184_vm1, %v2311_v19 }
 0x289   :  { %v5204_v47 = vpop.eup %5203  ;;  %2314 = vst.msk [vmem:[#allocation2 + $0x1] sm:$0xff] %vm184_vm1, %v2310_v43 }
 0x28a   :  { %v5206_v21 = vpop.eup %5205  ;;  %v2313_v22 = vmul.f32 %v5204_v47, %v2265_v63  ;;  %v2986_v47 = vand.u32 4294901760, %v2985_v16 }
 0x28b   :  { %v2312_v23 = vmul.f32 %v5206_v21, %v2264_v25  ;;  %v2993_v21 = vand.u32 4294901760, %v2992_v17 }
 0x28c   :  { %2317 = vst.msk [vmem:[#allocation2 + $0x49] sm:$0xff] %vm184_vm1, %v2313_v22 }
 0x28d   :  { %2316 = vst.msk [vmem:[#allocation2 + $0x31] sm:$0xff] %vm184_vm1, %v2312_v23  ;;  %v4990_v23 = vpack.c.bf16 %v2993_v21, %v2986_v47 }
 0x28f   :  { %v2323_v26 = vld [vmem:[#allocation2 + $0x19] ss:$2 sm:$0xf]  ;;  %v2319_v46 = vld [vmem:[#allocation2 + $0x18] ss:$2 sm:$0xf] }
 0x290   :  { %v2322_v41 = vld [vmem:[#allocation2 + $0x1] ss:$2 sm:$0xf]  ;;  %v2318_v59 = vld [vmem:[#allocation2] ss:$2 sm:$0xf] }
 0x291   :  { %v2334_v42 = vcombine.low %v2322_v41, %v2323_v26  ;;  %v4998_v41 = vpack.c.bf16 %v5791_v61, %v5789_v48 }
 0x293   :  { %v2336_v29 = vsel %vm184_vm1, %v2334_v42, 0  ;;  %v2325_v18 = vld [vmem:[#allocation2 + $0x49] ss:$2 sm:$0xf] }
 0x294   :  { %v5738_v24 = vand.u32 4294901760, %v2336_v29  ;;  %v2324_v27 = vld [vmem:[#allocation2 + $0x31] ss:$2 sm:$0xf] }
 0x295   :  { %v2335_v31 = vcombine.low %v2324_v27, %v2325_v18  ;;  %v2321_v60 = vld [vmem:[#allocation2 + $0x48] ss:$2 sm:$0xf]  ;;  %v59_v27 = vld [vmem:[%s5892_s4 + $0x40] sm:$0xff] }
 0x296   :  { %v2410_v32 = vsub.f32 %v2336_v29, %v5738_v24  ;;  %v2326_v42 = vld [vmem:[#allocation2 + $0x2] ss:$2 sm:$0xf]  ;;  %v2327_v29 = vld [vmem:[#allocation2 + $0x1a] ss:$2 sm:$0xf] }
 0x297   :  { %v2338_v34 = vsel %vm184_vm1, %v2335_v31, 0  ;;  %v3410_v18 = vcombine.low %v2326_v42, %v2327_v29  ;;  %v60_v31 = vld [vmem:[%s5892_s4 + $0x48] sm:$0xff] }
 0x298   :  { %v2411_v63 = vand.u32 4294901760, %v2410_v32  ;;  %v5742_v33 = vand.u32 4294901760, %v2338_v34 }
 0x29a   :  { %v2412_v25 = vsub.f32 %v2410_v32, %v2411_v63  ;;  %v2420_v51 = vsub.f32 %v2338_v34, %v5742_v33  ;;  %v2328_v34 = vld [vmem:[#allocation2 + $0x32] ss:$2 sm:$0xf] }
 0x29c   :  { %v2413_v49 = vand.u32 4294901760, %v2412_v25  ;;  %v2421_v15 = vand.u32 4294901760, %v2420_v51  ;;  %v5014_v25 = vpack.c.bf16 %v2991_v10, %v2984_v9 }
 0x29e   :  { %4596 = vmatprep.mubr.f32.mxu1 %v2413_v49  ;;  %v2422_v53 = vsub.f32 %v2420_v51, %v2421_v15 }
 0x2a0   :  { %v2423_v57 = vand.u32 4294901760, %v2422_v53  ;;  %v62_v53 = vld [vmem:[%s5892_s4 + $0x58] sm:$0xff] }
 0x2a2   :  { %4597 = vmatmul.mubr.f32.vlgmr.msra.gmra.mrb[0].mxu1 %v2423_v57 }
 0x2a3   :  { %4941 = vmatpush3.bf16.msra.mxu1 %v5709_v28  ;;  %4607 = vmatprep.mubr.f32.mxu1 %v5738_v24  ;;  %v2872_v28 = vcombine.low %v2318_v59, %v2319_v46 }
 0x2a4   :  { %4943 = vmatprep.subr.bf16.mxu1 %v5712_v38 }
 0x2a5   :  { %v2874_v45 = vsel %vm184_vm1, %v2872_v28, 0  ;;  %v3426_v28 = vand.u32 4294901760, %v62_v53 }
 0x2a6   :  { %v5766_v58 = vand.u32 4294901760, %v2874_v45 }
 0x2a7   :  { %4945 = vmatpush3.bf16.msra.mxu1 %v5712_v38  ;;  %v51_v38 = vld [vmem:[%s5892_s4] sm:$0xff]  ;;  %v3528_v30 = vsub.f32 %v62_v53, %v3426_v28 }
 0x2a8   :  { %4947 = vmatprep.subr.bf16.mxu1 %v5714_v39  ;;  %v2879_v62 = vand.u32 4294901760, %v51_v38  ;;  %v2948_v55 = vsub.f32 %v2874_v45, %v5766_v58 }
 0x2aa   :  { %4608 = vmatmul.mubr.f32.vlgmr.msra.gmra.mrb[0].mxu1 %v5742_v33  ;;  %v5776_v2 = vsub.f32 %v51_v38, %v2879_v62  ;;  %v2949_v6 = vand.u32 4294901760, %v2948_v55 }
 0x2ab   :  { %4949 = vmatpush3.bf16.msra.mxu1 %v5714_v39  ;;  %4618 = vmatprep.mubr.f32.mxu1 %v2410_v32  ;;  %v52_v39 = vld [vmem:[%s5892_s4 + $0x8] sm:$0xff]  ;;  %v3412_v32 = vsel %vm184_vm1, %v3410_v18, 0 }
 0x2ac   :  { %4951 = vmatprep.subr.bf16.mxu1 %v5716_v44  ;;  %v2882_v20 = vand.u32 4294901760, %v52_v39  ;;  %v2970_v37 = vand.u32 4294901760, %v5776_v2  ;;  %v2950_v11 = vsub.f32 %v2948_v55, %v2949_v6  ;;  %v5831_v49 = vand.u32 4294901760, %v3412_v32 }
 0x2ae   :  { %v5779_v54 = vsub.f32 %v52_v39, %v2882_v20  ;;  %v2971_v7 = vsub.f32 %v5776_v2, %v2970_v37  ;;  %v2951_v19 = vand.u32 4294901760, %v2950_v11  ;;  %v3486_v39 = vsub.f32 %v3412_v32, %v5831_v49 }
 0x2af   :  { %4953 = vmatpush3.bf16.msra.mxu1 %v5716_v44  ;;  %v2320_v44 = vld [vmem:[#allocation2 + $0x30] ss:$2 sm:$0xf] }
 0x2b0   :  { %4955 = vmatprep.subr.bf16.mxu1 %v5701_v36  ;;  %v2873_v1 = vcombine.low %v2320_v44, %v2321_v60  ;;  %v2972_v12 = vand.u32 4294901760, %v2971_v7  ;;  %v4994_v26 = vpack.c.bf16 %v5779_v54, %v5776_v2  ;;  %v3487_v35 = vand.u32 4294901760, %v3486_v39 }
 0x2b2   :  { %4619 = vmatmul.mubr.f32.vlgmr.msra.gmra.mrb[0].mxu1 %v2420_v51  ;;  %v2876_v56 = vsel %vm184_vm1, %v2873_v1, 0  ;;  %v3420_v51 = vand.u32 4294901760, %v60_v31 }
 0x2b3   :  { %4957 = vmatpush3.bf16.msra.mxu1 %v5701_v36  ;;  %4629 = vmatprep.mubr.f32.mxu1 %v2411_v63  ;;  %v5787_v0 = vand.u32 4294901760, %v2876_v56  ;;  %v2329_v63 = vld [vmem:[#allocation2 + $0x4a] ss:$2 sm:$0xf] }
 0x2b4   :  { %4959 = vmatprep.subr.bf16.mxu1 %v5703_v40  ;;  %v3411_v57 = vcombine.low %v2328_v34, %v2329_v63  ;;  %v3514_v38 = vsub.f32 %v60_v31, %v3420_v51 }
 0x2b5   :  { %v2958_v8 = vsub.f32 %v2876_v56, %v5787_v0  ;;  %v3488_v56 = vsub.f32 %v3486_v39, %v3487_v35 }
 0x2b6   :  { %v3414_v45 = vsel %vm184_vm1, %v3411_v57, 0  ;;  %v3515_v60 = vand.u32 4294901760, %v3514_v38 }
 0x2b7   :  { %4961 = vmatpush3.bf16.msra.mxu1 %v5703_v40  ;;  %v2959_v14 = vand.u32 4294901760, %v2958_v8 }
 0x2b8   :  { %4963 = vmatprep.subr.bf16.mxu1 %v5718_v4 }
 0x2b9   :  { %v2960_v43 = vsub.f32 %v2958_v8, %v2959_v14 }
 0x2ba   :  { %4630 = vmatmul.mubr.f32.vlgmr.msra.gmra.mrb[0].mxu1 %v2421_v15  ;;  %v61_v15 = vld [vmem:[%s5892_s4 + $0x50] sm:$0xff] }
 0x2bb   :  { %4965 = vmatpush3.bf16.msra.mxu1 %v5718_v4  ;;  %4640 = vmatprep.mubr.f32.mxu1 %v5738_v24  ;;  %v2977_v4 = vand.u32 4294901760, %v5779_v54  ;;  %v2961_v22 = vand.u32 4294901760, %v2960_v43  ;;  %v3423_v46 = vand.u32 4294901760, %v61_v15 }
 0x2bc   :  { %4967 = vmatprep.subr.bf16.mxu1 %v5720_v50 }
 0x2bd   :  { %v2978_v52 = vsub.f32 %v5779_v54, %v2977_v4 }
 0x2bf   :  { %4969 = vmatpush3.bf16.msra.mxu1 %v5720_v50  ;;  %v5796_v50 = vpack.c.bf16 %v2882_v20, %v2879_v62  ;;  %v2979_v13 = vand.u32 4294901760, %v2978_v52  ;;  %v5846_v62 = vand.u32 4294901760, %v3414_v45  ;;  %v3521_v20 = vsub.f32 %v61_v15, %v3423_v46 }
 0x2c0   :  { %4971 = vmatprep.subr.bf16.mxu1 %v5701_v36 }
 0x2c1   :  { %v3522_v54 = vand.u32 4294901760, %v3521_v20 }
 0x2c2   :  { %4641 = vmatmul.mubr.f32.vlgmr.msra.gmra.mrb[0].mxu1 %v5742_v33 }
 0x2c3   :  { %4973 = vmatpush3.bf16.msra.mxu1 %v5701_v36  ;;  %4651 = vmatprep.mubr.f32.mxu1 %v5738_v24  ;;  %v5805_v36 = vpack.c.bf16 %v2888_v5, %v2885_v3  ;;  %v5010_v24 = vpack.c.bf16 %v2977_v4, %v2970_v37  ;;  %v3516_v3 = vsub.f32 %v3514_v38, %v3515_v60 }
 0x2c4   :  { %4975 = vmatprep.subr.bf16.mxu1 %v5703_v40  ;;  %v3496_v5 = vsub.f32 %v3414_v45, %v5846_v62  ;;  %v5030_v37 = vpack.c.bf16 %v3426_v28, %v3423_v46 }
 0x2c5   :  { %v3517_v48 = vand.u32 4294901760, %v3516_v3 }
 0x2c6   :  { %v3497_v61 = vand.u32 4294901760, %v3496_v5 }
 0x2c7   :  { %4977 = vmatpush3.bf16.msra.mxu1 %v5703_v40  ;;  %v4986_v40 = vpack.c.bf16 %v2979_v13, %v2972_v12 }
 0x2c8   :  { %4979 = vmatprep.subr.bf16.mxu1 %v5796_v50  ;;  %v3498_v52 = vsub.f32 %v3496_v5, %v3497_v61 }
 0x2ca   :  { %4652 = vmatmul.mubr.f32.vlgmr.msra.gmra.mrb[0].mxu1 %v5742_v33  ;;  %v3417_v33 = vand.u32 4294901760, %v59_v27  ;;  %v3499_v10 = vand.u32 4294901760, %v3498_v52 }
 0x2cb   :  { %4981 = vmatpush3.bf16.msra.mxu1 %v5796_v50  ;;  %4662 = vmatprep.mubr.f32.mxu1 %v2951_v19 }
 0x2cc   :  { %4983 = vmatprep.subr.bf16.mxu1 %v5805_v36  ;;  %v5840_v59 = vsub.f32 %v59_v27, %v3417_v33  ;;  %v5026_v1 = vpack.c.bf16 %v3420_v51, %v3417_v33 }
 0x2ce   :  { %v3508_v44 = vand.u32 4294901760, %v5840_v59 }
 0x2cf   :  { %4985 = vmatpush3.bf16.msra.mxu1 %v5805_v36 }
 0x2d0   :  { %4987 = vmatprep.subr.bf16.mxu1 %v4986_v40  ;;  %v3509_v2 = vsub.f32 %v5840_v59, %v3508_v44  ;;  %v5058_v12 = vpack.c.bf16 %v3515_v60, %v3508_v44 }
 0x2d2   :  { %4663 = vmatmul.mubr.f32.vlgmr.msra.gmra.mrb[0].mxu1 %v2961_v22  ;;  %v3510_v4 = vand.u32 4294901760, %v3509_v2 }
 0x2d3   :  { %4989 = vmatpush3.bf16.msra.mxu1 %v4986_v40  ;;  %4673 = vmatprep.mubr.f32.mxu1 %v5766_v58 }
 0x2d4   :  { %4991 = vmatprep.subr.bf16.mxu1 %v4990_v23  ;;  %v5034_v7 = vpack.c.bf16 %v3517_v48, %v3510_v4 }
 0x2d7   :  { %4993 = vmatpush3.bf16.msra.mxu1 %v4990_v23 }
 0x2d8   :  { %4995 = vmatprep.subr.bf16.mxu1 %v4994_v26 }
 0x2da   :  { %4674 = vmatmul.mubr.f32.vlgmr.msra.gmra.mrb[0].mxu1 %v5787_v0 }
 0x2db   :  { %4997 = vmatpush3.bf16.msra.mxu1 %v4994_v26  ;;  %4684 = vmatprep.mubr.f32.mxu1 %v2948_v55  ;;  %v3529_v55 = vand.u32 4294901760, %v3528_v30 }
 0x2dc   :  { %4999 = vmatprep.subr.bf16.mxu1 %v4998_v41 }
 0x2dd   :  { %v5062_v13 = vpack.c.bf16 %v3529_v55, %v3522_v54 }
 0x2df   :  { %5001 = vmatpush3.bf16.msra.mxu1 %v4998_v41 }
 0x2e0   :  { %5003 = vmatprep.subr.bf16.mxu1 %v5796_v50 }
 0x2e2   :  { %4685 = vmatmul.mubr.f32.vlgmr.msra.gmra.mrb[0].mxu1 %v2958_v8 }
 0x2e3   :  { %5005 = vmatpush3.bf16.msra.mxu1 %v5796_v50  ;;  %4695 = vmatprep.mubr.f32.mxu1 %v2949_v6  ;;  %v3523_v6 = vsub.f32 %v3521_v20, %v3522_v54 }
 0x2e4   :  { %5007 = vmatprep.subr.bf16.mxu1 %v5805_v36 }
 0x2e5   :  { %v3524_v8 = vand.u32 4294901760, %v3523_v6 }
 0x2e7   :  { %5009 = vmatpush3.bf16.msra.mxu1 %v5805_v36 }
 0x2e8   :  { %5011 = vmatprep.subr.bf16.mxu1 %v5010_v24 }
 0x2ea   :  { %4696 = vmatmul.mubr.f32.vlgmr.msra.gmra.mrb[0].mxu1 %v2959_v14  ;;  %v4083_v14 = vld [vmem:[%s5893_s5] ss:$0 sm:$0xff]  ;;  %s5242_s5 = smov [#allocation3]  }
 0x2eb   :  { %5013 = vmatpush3.bf16.msra.mxu1 %v5010_v24  ;;  %4706 = vmatprep.mubr.f32.mxu1 %v5766_v58  ;;  %s4071_s12 = sshll.u32 %s5242_s5, 4  ;;  %s4072_s12 = int_to_ptr.vmem [resolvable:$true] %s4071_s12 }
 0x2ec   :  { %5015 = vmatprep.subr.bf16.mxu1 %v5014_v25  ;;  %s5215_s2 = scalar_lea.vmem %s4072_s12, 256  ;;  %p5220_p1 = scmp.lt.s32.totalorder %s4072_s12, %s4072_s12 }
 0x2ed   :  { %p5216_p0 = scmp.ne.s32.totalorder %s4072_s12, %s5215_s2  ;;  %p5221_p2 = scmp.lt.s32.totalorder %s5215_s2, %s5215_s2 }
 0x2ef   :  { %5017 = vmatpush3.bf16.msra.mxu1 %v5014_v25  ;;  %p5222_p3 = por %p5221_p2, %p5220_p1 }
 0x2f0   :  { %5019 = vmatprep.subr.bf16.mxu1 %v5796_v50 }
 0x2f1   :  { %p5223_p4 = pnand %p5222_p3, %p5216_p0 }
 0x2f2   :  { %4707 = vmatmul.mubr.f32.vlgmr.msra.gmra.mrb[0].mxu1 %v5787_v0 }
 0x2f3   :  { %5021 = vmatpush3.bf16.msra.mxu1 %v5796_v50  ;;  %4717 = vmatprep.mubr.f32.mxu1 %v5766_v58  ;;  %v3530_v58 = vsub.f32 %v3528_v30, %v3529_v55  ;;  %v3489_v50 = vand.u32 4294901760, %v3488_v56 }
 0x2f4   :  { %5023 = vmatprep.subr.bf16.mxu1 %v5805_v36 }
 0x2f5   :  { %v3531_v9 = vand.u32 4294901760, %v3530_v58 }
 0x2f7   :  { %5025 = vmatpush3.bf16.msra.mxu1 %v5805_v36  ;;  %v5038_v11 = vpack.c.bf16 %v3531_v9, %v3524_v8  ;;  %v5042_v36 = vpack.c.bf16 %v3514_v38, %v5840_v59 }
 0x2f8   :  { %5027 = vmatprep.subr.bf16.mxu1 %v5026_v1 }
 0x2fa   :  { %4718 = vmatmul.mubr.f32.vlgmr.msra.gmra.mrb[0].mxu1 %v5787_v0  ;;  %v5046_v0 = vpack.c.bf16 %v3528_v30, %v3521_v20 }
 0x2fb   :  { %5029 = vmatpush3.bf16.msra.mxu1 %v5026_v1  ;;  %4728 = vmatprep.mubr.f32.mxu1 %v3489_v50 }
 0x2fc   :  { %5031 = vmatprep.subr.bf16.mxu1 %v5030_v37 }
 0x2ff   :  { %5033 = vmatpush3.bf16.msra.mxu1 %v5030_v37 }
 0x300   :  { %5035 = vmatprep.subr.bf16.mxu1 %v5034_v7 }
 0x302   :  { %4729 = vmatmul.mubr.f32.vlgmr.msra.gmra.mrb[0].mxu1 %v3499_v10 }
 0x303   :  { %5037 = vmatpush3.bf16.msra.mxu1 %v5034_v7  ;;  %4739 = vmatprep.mubr.f32.mxu1 %v5831_v49 }
 0x304   :  { %5039 = vmatprep.subr.bf16.mxu1 %v5038_v11 }
 0x307   :  { %5041 = vmatpush3.bf16.msra.mxu1 %v5038_v11 }
 0x308   :  { %5043 = vmatprep.subr.bf16.mxu1 %v5042_v36 }
 0x30a   :  { %4740 = vmatmul.mubr.f32.vlgmr.msra.gmra.mrb[0].mxu1 %v5846_v62 }
 0x30b   :  { %5045 = vmatpush3.bf16.msra.mxu1 %v5042_v36  ;;  %4750 = vmatprep.mubr.f32.mxu1 %v3486_v39 }
 0x30c   :  { %5047 = vmatprep.subr.bf16.mxu1 %v5046_v0 }
 0x30f   :  { %5049 = vmatpush3.bf16.msra.mxu1 %v5046_v0 }
 0x310   :  { %5051 = vmatprep.subr.bf16.mxu1 %v5026_v1 }
 0x312   :  { %4751 = vmatmul.mubr.f32.vlgmr.msra.gmra.mrb[0].mxu1 %v3496_v5 }
 0x313   :  { %5053 = vmatpush3.bf16.msra.mxu1 %v5026_v1  ;;  %4761 = vmatprep.mubr.f32.mxu1 %v3487_v35 }
 0x314   :  { %5055 = vmatprep.subr.bf16.mxu1 %v5030_v37 }
 0x317   :  { %5057 = vmatpush3.bf16.msra.mxu1 %v5030_v37 }
 0x318   :  { %5059 = vmatprep.subr.bf16.mxu1 %v5058_v12 }
 0x31a   :  { %4762 = vmatmul.mubr.f32.vlgmr.msra.gmra.mrb[0].mxu1 %v3497_v61 }
 0x31b   :  { %5061 = vmatpush3.bf16.msra.mxu1 %v5058_v12  ;;  %4772 = vmatprep.mubr.f32.mxu1 %v5831_v49 }
 0x31c   :  { %5063 = vmatprep.subr.bf16.mxu1 %v5062_v13 }
 0x31f   :  { %5065 = vmatpush3.bf16.msra.mxu1 %v5062_v13 }
 0x320   :  { %5067 = vmatprep.subr.bf16.mxu1 %v5026_v1 }
 0x322   :  { %4773 = vmatmul.mubr.f32.vlgmr.msra.gmra.mrb[0].mxu1 %v5846_v62 }
 0x323   :  { %5069 = vmatpush3.bf16.msra.mxu1 %v5026_v1  ;;  %4783 = vmatprep.mubr.f32.mxu1 %v5831_v49 }
 0x324   :  { %5071 = vmatprep.subr.bf16.mxu1 %v5030_v37 }
 0x327   :  { %5073 = vmatpush3.bf16.msra.mxu1 %v5030_v37 }
 0x32a   :  { %4784 = vmatmul.mubr.f32.vlgmr.msra.gmra.mrb[0].mxu1 %v5846_v62 }
 0x3fd   :  { %v4785_v16 = vpop.f32.mrb[0].mxu1 }
 0x3fe   :  { %v3949_v17 = vcombine.high %v4785_v16, %v4785_v16  ;;  %v3960_v19 = vadd.f32 %v4785_v16, %v4083_v14  ;;  %v3934_v40 = vpop.f32.mrb[1].mxu1 }
 0x3ff   :  { %v3948_v43 = vcombine.high %v3934_v40, %v3934_v40  ;;  %v3958_v47 = vadd.f32 %v4083_v14, %v3934_v40 }
 0x400   :  { %v3961_v21 = vadd.f32 %v4083_v14, %v3949_v17  ;;  %v3964_v22 = vmul.f32 0.1, %v3960_v19 }
 0x401   :  { %v3959_v23 = vadd.f32 %v4083_v14, %v3948_v43  ;;  %v3962_v26 = vmul.f32 0.1, %v3958_v47 }
 0x402   :  { %v3965_v41 = vmul.f32 0.1, %v3961_v21  ;;  %v3968_v42 = vmax.f32 %v3960_v19, %v3964_v22 }
 0x403   :  { %v3963_v29 = vmul.f32 0.1, %v3959_v23  ;;  %v3966_v18 = vmax.f32 %v3958_v47, %v3962_v26 }
 0x404   :  { %v3969_v24 = vmax.f32 %v3961_v21, %v3965_v41  ;;  %v3985_v27 = vsel %vm3970_vm2, %v3968_v42, 0.0 }
 0x405   :  { %v3986_v31 = vrot.slane %v3985_v27, 4  ;;  %v3967_v32 = vmax.f32 %v3959_v23, %v3963_v29  ;;  %v3971_v34 = vsel %vm3970_vm2, %v3966_v18, 0.0 }
 0x406   :  { %v3992_v63 = vsel %vm3970_vm2, %v3969_v24, 0.0  ;;  %v3972_v33 = vrot.slane %v3971_v34, 4 }
 0x407   :  { %v3987_v25 = vadd.f32 %v3986_v31, %v3985_v27  ;;  %v3993_v51 = vrot.slane %v3992_v63, 4  ;;  %v3978_v49 = vsel %vm3970_vm2, %v3967_v32, 0.0 }
 0x408   :  { %v3973_v15 = vadd.f32 %v3972_v33, %v3971_v34  ;;  %v3979_v53 = vrot.slane %v3978_v49, 4 }
 0x409   :  { %v3988_v57 = vrot.slane %v3987_v25, 2  ;;  %v3994_v59 = vadd.f32 %v3993_v51, %v3992_v63 }
 0x40a   :  { %v3974_v46 = vrot.slane %v3973_v15, 2  ;;  %v3980_v28 = vadd.f32 %v3979_v53, %v3978_v49 }
 0x40b   :  { %v3989_v38 = vadd.f32 %v3988_v57, %v3987_v25  ;;  %v3995_v39 = vrot.slane %v3994_v59, 2 }
 0x40c   :  { %v3975_v45 = vadd.f32 %v3974_v46, %v3973_v15  ;;  %v3981_v44 = vrot.slane %v3980_v28, 2 }
 0x40d   :  { %v3990_v60 = vrot.slane %v3989_v38, 1  ;;  %v3996_v62 = vadd.f32 %v3995_v39, %v3994_v59 }
 0x40e   :  { %v3976_v20 = vrot.slane %v3975_v45, 1  ;;  %v3982_v30 = vadd.f32 %v3981_v44, %v3980_v28 }
 0x40f   :  { %v3991_v35 = vadd.f32 %v3990_v60, %v3989_v38  ;;  %v3997_v1 = vrot.slane %v3996_v62, 1 }
 0x410   :  { %v3977_v2 = vadd.f32 %v3976_v20, %v3975_v45  ;;  %v3983_v3 = vrot.slane %v3982_v30, 1 }
 0x411   :  { %v3998_v5 = vadd.f32 %v3997_v1, %v3996_v62  ;;  %v4002_v54 = vmul.f32 0.25, %v3991_v35 }
 0x412   :  { %v3984_v55 = vadd.f32 %v3983_v3, %v3982_v30  ;;  %v4000_v56 = vmul.f32 0.25, %v3977_v2 }
 0x413   :  { %v4003_v37 = vmul.f32 0.25, %v3998_v5  ;;  %v4006_v4 = vsub.f32 %v3968_v42, %v4002_v54 }
 0x414   :  { %v4001_v48 = vmul.f32 0.25, %v3984_v55  ;;  %v4004_v61 = vsub.f32 %v3966_v18, %v4000_v56 }
 0x415   :  { %v4007_v6 = vsub.f32 %v3969_v24, %v4003_v37  ;;  %v4010_v58 = vmul.f32 %v4006_v4, %v4006_v4 }
 0x416   :  { %v4005_v50 = vsub.f32 %v3967_v32, %v4001_v48  ;;  %v4008_v7 = vmul.f32 %v4004_v61, %v4004_v61 }
 0x417   :  { %v4011_v52 = vmul.f32 %v4007_v6, %v4007_v6  ;;  %v4026_v8 = vsel %vm3970_vm2, %v4010_v58, 0.0 }
 0x418   :  { %v4027_v9 = vrot.slane %v4026_v8, 4  ;;  %v4009_v10 = vmul.f32 %v4005_v50, %v4005_v50  ;;  %v4012_v11 = vsel %vm3970_vm2, %v4008_v7, 0.0 }
 0x419   :  { %v4033_v36 = vsel %vm3970_vm2, %v4011_v52, 0.0  ;;  %v4013_v0 = vrot.slane %v4012_v11, 4 }
 0x41a   :  { %v4028_v12 = vadd.f32 %v4027_v9, %v4026_v8  ;;  %v4034_v13 = vrot.slane %v4033_v36, 4  ;;  %v4019_v14 = vsel %vm3970_vm2, %v4009_v10, 0.0 }
 0x41b   :  { %v4014_v16 = vadd.f32 %v4013_v0, %v4012_v11  ;;  %v4020_v17 = vrot.slane %v4019_v14, 4 }
 0x41c   :  { %v4029_v19 = vrot.slane %v4028_v12, 2  ;;  %v4035_v40 = vadd.f32 %v4034_v13, %v4033_v36 }
 0x41d   :  { %v4015_v43 = vrot.slane %v4014_v16, 2  ;;  %v4021_v47 = vadd.f32 %v4020_v17, %v4019_v14 }
 0x41e   :  { %v4030_v21 = vadd.f32 %v4029_v19, %v4028_v12  ;;  %v4036_v22 = vrot.slane %v4035_v40, 2 }
 0x41f   :  { %v4016_v23 = vadd.f32 %v4015_v43, %v4014_v16  ;;  %v4022_v26 = vrot.slane %v4021_v47, 2 }
 0x420   :  { %v4031_v41 = vrot.slane %v4030_v21, 1  ;;  %v4037_v42 = vadd.f32 %v4036_v22, %v4035_v40 }
 0x421   :  { %v4017_v29 = vrot.slane %v4016_v23, 1  ;;  %v4023_v18 = vadd.f32 %v4022_v26, %v4021_v47 }
 0x422   :  { %v4032_v24 = vadd.f32 %v4031_v41, %v4030_v21  ;;  %v4038_v27 = vrot.slane %v4037_v42, 1 }
 0x423   :  { %v4018_v31 = vadd.f32 %v4017_v29, %v4016_v23  ;;  %v4024_v32 = vrot.slane %v4023_v18, 1 }
 0x424   :  { %v4039_v34 = vadd.f32 %v4038_v27, %v4037_v42  ;;  %v4042_v63 = vmul.f32 0.25, %v4032_v24 }
 0x425   :  { %v4025_v33 = vadd.f32 %v4024_v32, %v4023_v18  ;;  %v4040_v25 = vmul.f32 0.25, %v4018_v31 }
 0x426   :  { %v4043_v51 = vmul.f32 0.25, %v4039_v34  ;;  %v4046_v49 = vadd.f32 1e-05, %v4042_v63 }
 0x427   :  { %v4041_v15 = vmul.f32 0.25, %v4025_v33  ;;  %v4044_v53 = vadd.f32 1e-05, %v4040_v25 }
 0x428   :  { %v4047_v57 = vadd.f32 1e-05, %v4043_v51  ;;  %5207 = vrsqrt.f32 %v4046_v49 }
 0x429   :  { %v4045_v59 = vadd.f32 1e-05, %v4041_v15  ;;  %5209 = vrsqrt.f32 %v4044_v53 }
 0x42a   :  { %5211 = vrsqrt.f32 %v4047_v57 }
 0x42b   :  { %5213 = vrsqrt.f32 %v4045_v59 }
 0x432   :  { %v5208_v46 = vpop.eup %5207 }
 0x433   :  { %v5210_v28 = vpop.eup %5209  ;;  %v4054_v45 = vmul.f32 %v5208_v46, %v4006_v4 }
 0x434   :  { %v5212_v38 = vpop.eup %5211  ;;  %v4052_v60 = vmul.f32 %v5210_v28, %v4004_v61 }
 0x435   :  { %v5214_v39 = vpop.eup %5213  ;;  %v4055_v44 = vmul.f32 %v5212_v38, %v4007_v6 }
 0x436   :  { %v4053_v62 = vmul.f32 %v5214_v39, %v4005_v50 }
 0x437   :  { %v4061_v20 = vcombine.low %v4054_v45, %v4055_v44 }
 0x438   :  { %v4060_v30 = vcombine.low %v4052_v60, %v4053_v62 }
 0x439   :  { %4065 = vst.msk [vmem:[#allocation3 + $0x8] sm:$0xff] %vm184_vm1, %v4061_v20 }
 0x43a   :  { %4064 = vst.msk [vmem:[#allocation3] sm:$0xff] %vm184_vm1, %v4060_v30 }
 0x43b   :  { %5226 = shalt.err (!%p5223_p4)
}
 0x43c   :  { %s5227_s15 = scalar_lea.hbm %s5894_s6, 256 }
 0x43d   :  { %p5228_p5 = scmp.ne.s32.totalorder %s5894_s6, %s5227_s15  ;;  %p5231_p6 = scmp.lt.u32.totalorder %s5227_s15, %s5894_s6 }
 0x43f   :  { %p5233_p7 = pnand %p5231_p6, %p5228_p5 }
 0x441   :  { %5236 = shalt.err (!%p5233_p7)
}
 0x442   :  { %s5243_s19 = smov 128   ;;  %s5244_s20 = smov 8  }
 0x443   :  { %4077 = dma.vmem_to_hbm [thread:$0]  %s4072_s12, 256, %s5894_s6, [#allocation4], %s5243_s19, %s5243_s19, %s5244_s20  }
 0x444   :  { %5237 = dma.done.wait [#allocation4], 256  }
 0x445   :  { %5238 = vsyncadd [#allocation4], 4294967040 }
 0x446   :  { %4081 = vsyncpa [#allocation4], 1 }

</bundles_post_ra>
